<compile_context>
chip_gen: v6e
topology: v6e:2x2x1
jax: 0.10.0
libtpu: 0.0.40
codegen_flags: <defaults>
</compile_context>

<pallas_src>
import functools

import jax
import jax.numpy as jnp
from jax import lax
from jax.experimental import pallas as pl
from jax.experimental.pallas import tpu as pltpu

EPS = 1e-5


# ----------------------------------------------------------------------------
# small helpers
# ----------------------------------------------------------------------------
def _largest_divisor(n, cap):
    for d in range(min(n, cap), 0, -1):
        if n % d == 0:
            return d
    return 1


def _round_up(n, m):
    return ((n + m - 1) // m) * m


def _epilogue_block(n):
    """Rows-per-step for the epilogue: <= 64 samples, multiple of 8 unless full."""
    if n <= 64:
        return n
    for d in range(64, 7, -1):
        if n % d == 0 and d % 8 == 0:
            return d
    return n


def _stable_sigmoid(x):
    # exp() of a non-positive argument only -> no inf/nan intermediates.
    e = jnp.exp(-jnp.abs(x))
    return jnp.where(x >= 0, 1.0 / (1.0 + e), e / (1.0 + e))


# ----------------------------------------------------------------------------
# Pallas kernels
# ----------------------------------------------------------------------------
def conv1_stats_kernel(p_ref, w_ref, st_ref):
    """BN1 pass 1: bias-free conv1 on lane-packed patches -> per-lane sum/sumsq.

    p_ref : [tm8, 128] bf16  (8 output positions x 16 patch values per row)
    w_ref : [128, 512] bf16  block-diagonal conv1 weight (8 x [16,64] on the diag)
    st_ref: [1, 2, 512] f32  per-block partial statistics (reduced on host)
    """
    y = jnp.dot(p_ref[...], w_ref[...], preferred_element_type=jnp.float32)
    s = jnp.concatenate(
        [jnp.sum(y, axis=0, keepdims=True),
         jnp.sum(y * y, axis=0, keepdims=True)], axis=0)            # (2, 512)
    st_ref[...] = s[None, :, :]


def conv_fused_kernel(pz_ref, w1_ref, s1_ref, sh1_ref, mz_ref, w2_ref, b2_ref,
                      m64_ref, y_ref, st_ref, *, bn):
    """Fused conv1-apply(+BN1+ReLU, Z2-ordered) + conv2 + BN2 partial stats.

    pz_ref : [bn*72, 128] bf16  conv1 patches, ordered/duplicated for conv2 taps
    w1_ref : [128, 512]   bf16  block-diagonal conv1 weight (shared with pass 1)
    s1_ref : [1, 512]     f32   BN1 scale (per channel, tiled over the 8 groups)
    sh1_ref: [1, 512]     f32   BN1 shift (conv1 bias folded in)
    mz_ref : [72, 512]    f32   1 where the a1 source position is inside 14x14
    w2_ref : [2, 512, 128] bf16 conv2 weights, one K=512 slab per row-tap dh
    b2_ref : [1, 128]     f32   conv2 bias
    m64_ref: [64, 128]    f32   1 on the valid 7x7 positions of the 8x8 grid
    y_ref  : [bn*64, 128] bf16  pre-BN conv2 output (row = sample*64 + oh*8 + ow)
    st_ref : [1, 2, 128]  f32   per-block BN2 partial statistics
    """
    # conv1 (no bias) + BN1 + ReLU, directly in the space-to-depth layout.
    y1 = jnp.dot(pz_ref[...], w1_ref[...], preferred_element_type=jnp.float32)
    a = jnp.maximum(y1 * s1_ref[...] + sh1_ref[...], 0.0)
    a = a.reshape(bn, 72, 512) * mz_ref[...][None, :, :]   # zero conv2 spatial padding

    # conv2: two contiguous row slabs (dh = 0, 1), each a K=512 matmul.
    t0 = a[:, 0:64, :].reshape(bn * 64, 512).astype(jnp.bfloat16)
    t1 = a[:, 8:72, :].reshape(bn * 64, 512).astype(jnp.bfloat16)
    y2 = (jnp.dot(t0, w2_ref[0], preferred_element_type=jnp.float32)
          + jnp.dot(t1, w2_ref[1], preferred_element_type=jnp.float32)
          + b2_ref[...])                                     # (bn*64, 128) f32
    y_ref[...] = y2.astype(y_ref.dtype)

    # BN2 statistics over the valid 7x7 output positions only (hoisted mask).
    ym = (y2.reshape(bn, 64, 128) * m64_ref[...][None, :, :]).reshape(bn * 64, 128)
    s = jnp.concatenate(
        [jnp.sum(ym, axis=0, keepdims=True),
         jnp.sum(ym * y2, axis=0, keepdims=True)], axis=0)   # (2, 128)
    st_ref[...] = s[None, :, :]


def bn2_dense_sigmoid_kernel(y_ref, s2_ref, sh2_ref, wd_ref, bd_ref, o_ref, *, bbe):
    """Fused BN2 + ReLU + Linear(6272 -> 1) + sigmoid (VPU multiply-reduce)."""
    a = jnp.maximum(y_ref[...].astype(jnp.float32) * s2_ref[...] + sh2_ref[...], 0.0)
    # wd is zero at the padded (row/col 7) spatial positions, so they drop out here.
    prod = a.reshape(bbe, 64, 128) * wd_ref[...][None, :, :]
    logit = jnp.sum(jnp.sum(prod, axis=2), axis=1, keepdims=True) + bd_ref[...]
    o_ref[...] = _stable_sigmoid(logit)


# ----------------------------------------------------------------------------
# pallas_call wrappers
# ----------------------------------------------------------------------------
def conv1_stats_call(p8, w1big, tm8):
    ga = p8.shape[0] // tm8
    return pl.pallas_call(
        conv1_stats_kernel,
        out_shape=jax.ShapeDtypeStruct((ga, 2, 512), jnp.float32),
        grid=(ga,),
        in_specs=[
            pl.BlockSpec((tm8, 128), lambda i: (i, 0)),
            pl.BlockSpec((128, 512), lambda i: (0, 0)),
        ],
        out_specs=pl.BlockSpec((1, 2, 512), lambda i: (i, 0, 0)),
        compiler_params=pltpu.CompilerParams(
            dimension_semantics=("parallel",),
            vmem_limit_bytes=32 * 1024 * 1024),
    )(p8, w1big)


def conv_fused_call(pz, w1big, s1, sh1, mz, w2, b2, m64, bn, n):
    gb = n // bn
    kernel = functools.partial(conv_fused_kernel, bn=bn)
    return pl.pallas_call(
        kernel,
        out_shape=(jax.ShapeDtypeStruct((n * 64, 128), jnp.bfloat16),
                   jax.ShapeDtypeStruct((gb, 2, 128), jnp.float32)),
        grid=(gb,),
        in_specs=[
            pl.BlockSpec((bn * 72, 128), lambda i: (i, 0)),
            pl.BlockSpec((128, 512), lambda i: (0, 0)),
            pl.BlockSpec((1, 512), lambda i: (0, 0)),
            pl.BlockSpec((1, 512), lambda i: (0, 0)),
            pl.BlockSpec((72, 512), lambda i: (0, 0)),
            pl.BlockSpec((2, 512, 128), lambda i: (0, 0, 0)),
            pl.BlockSpec((1, 128), lambda i: (0, 0)),
            pl.BlockSpec((64, 128), lambda i: (0, 0)),
        ],
        out_specs=(pl.BlockSpec((bn * 64, 128), lambda i: (i, 0)),
                   pl.BlockSpec((1, 2, 128), lambda i: (i, 0, 0))),
        compiler_params=pltpu.CompilerParams(
            dimension_semantics=("parallel",),
            vmem_limit_bytes=48 * 1024 * 1024),
    )(pz, w1big, s1, sh1, mz, w2, b2, m64)


def epilogue_call(y2, s2, sh2, wd, bd, bbe, n):
    gc = n // bbe
    kernel = functools.partial(bn2_dense_sigmoid_kernel, bbe=bbe)
    return pl.pallas_call(
        kernel,
        out_shape=jax.ShapeDtypeStruct((n, 1), jnp.float32),
        grid=(gc,),
        in_specs=[
            pl.BlockSpec((bbe * 64, 128), lambda i: (i, 0)),
            pl.BlockSpec((1, 128), lambda i: (0, 0)),
            pl.BlockSpec((1, 128), lambda i: (0, 0)),
            pl.BlockSpec((64, 128), lambda i: (0, 0)),
            pl.BlockSpec((1, 1), lambda i: (0, 0)),
        ],
        out_specs=pl.BlockSpec((bbe, 1), lambda i: (i, 0)),
        compiler_params=pltpu.CompilerParams(
            dimension_semantics=("parallel",),
            vmem_limit_bytes=32 * 1024 * 1024),
    )(y2, s2, sh2, wd, bd)


# ----------------------------------------------------------------------------
# host-side layout glue (strided slices / reshapes on tiny tensors) + weight prep
# ----------------------------------------------------------------------------
def _conv1_patches(x):
    """x: [N,1,28,28] -> conv1 im2col patches [N,14,14,16] (k = kh*4+kw), no gathers."""
    xp = jnp.pad(x[:, 0], ((0, 0), (1, 1), (1, 1)))                 # [N,30,30]
    cols = []
    for kh in range(4):
        for kw in range(4):
            cols.append(xp[:, kh:kh + 28:2, kw:kw + 28:2])          # [N,14,14]
    return jnp.stack(cols, axis=-1)                                  # [N,14,14,16]


def _pack_p8(p):
    """[N,14,14,16] -> [N*25,128]: 8 output positions per 128-lane row (196->200 pad)."""
    n = p.shape[0]
    flat = jnp.pad(p.reshape(n, 196, 16), ((0, 0), (0, 4), (0, 0)))  # [N,200,16]
    return flat.reshape(n * 25, 128)


def _pack_pz(p):
    """[N,14,14,16] -> [N*72,128]: conv1 patches reordered/duplicated so conv2 becomes
    two contiguous K=512 matmuls.  Row = n*72 + i*8 + j, lane = dw*64 + a*32 + b*16 + k,
    value = conv1-patch k of a1 position (2i+a-1, 2j+2dw+b-1) (zero outside 14x14)."""
    n = p.shape[0]
    pp = jnp.pad(p, ((0, 0), (1, 3), (1, 3), (0, 0)))                # [N,18,18,16]
    ppr = pp.reshape(n, 9, 2, 9, 2, 16)                              # (n,i,a,jj,b,k)
    taps = []
    for dw in range(2):
        t = ppr[:, :, :, dw:dw + 8, :, :]                            # (n,i,a,j,b,k)
        taps.append(t.transpose(0, 1, 3, 2, 4, 5))                   # (n,i,j,a,b,k)
    pz = jnp.stack(taps, axis=3)                                     # (n,i,j,dw,a,b,k)
    return pz.reshape(n * 72, 128)


def _w1_blockdiag(w1):
    """PyTorch [64,1,4,4] -> block-diagonal [128,512]: row s*16+k, col s*64+c."""
    w = w1.reshape(64, 16).T                                         # [16(k), 64(c)]
    eye8 = jnp.eye(8, dtype=w.dtype)
    big = eye8[:, None, :, None] * w[None, :, None, :]               # [8,16,8,64]
    return big.reshape(128, 512)


def _prep_w2(w2):
    """PyTorch [128,64,4,4] (co,ci,kh,kw) -> [2,512,128]: tap dh, m = dw*256+a*128+b*64+ci."""
    w = w2.reshape(128, 64, 2, 2, 2, 2)                              # (co,ci,dh,a,dw,b)
    w = w.transpose(2, 4, 3, 5, 1, 0)                                # (dh,dw,a,b,ci,co)
    return w.reshape(2, 512, 128)


def _prep_dense_weight(wd):
    """PyTorch [1,128*7*7] (flattened C,H,W) -> [64,128] (row=oh*8+ow), zero at pads."""
    w = wd.reshape(128, 7, 7).transpose(1, 2, 0)                     # [7,7,128]
    w = jnp.pad(w, ((0, 1), (0, 1), (0, 0)))                         # [8,8,128]
    return w.reshape(64, 128)


def _mask_z():
    """[72,512] mask: 1 where the a1 source position of a Z2 lane is inside 14x14."""
    i = jnp.arange(9)[:, None, None]
    j = jnp.arange(8)[None, :, None]
    m = jnp.arange(512)[None, None, :]
    dw = m // 256
    a = (m // 128) % 2
    b = (m // 64) % 2
    r = 2 * i + a - 1
    c = 2 * j + 2 * dw + b - 1
    valid = (r >= 0) & (r < 14) & (c >= 0) & (c < 14)
    return valid.astype(jnp.float32).reshape(72, 512)


def _mask_out():
    """[64,128] mask: 1 on the valid 7x7 positions of the 8x8 conv2 output grid."""
    r = jnp.arange(64)
    ok = ((r // 8) < 7) & ((r % 8) < 7)
    return jnp.broadcast_to(ok[:, None], (64, 128)).astype(jnp.float32)


# ----------------------------------------------------------------------------
# forward pass
# ----------------------------------------------------------------------------
@jax.jit
def discriminator_forward(x, params):
    n = x.shape[0]
    bf16, f32 = jnp.bfloat16, jnp.float32

    # host glue: im2col of the tiny 1-channel input (strided slices only)
    p = _conv1_patches(x)                                    # [N,14,14,16] f32
    p8 = _pack_p8(p).astype(bf16)                            # [N*25, 128]
    pz = _pack_pz(p).astype(bf16)                            # [N*72, 128]
    w1big = _w1_blockdiag(params["w1"]).astype(bf16)         # [128, 512]

    # ---- pass 1: BN1 batch statistics (bias folded in on the host) ----------
    m8 = p8.shape[0]
    tm8 = min(1024, _round_up(m8, 8))
    m8p = _round_up(m8, tm8)
    if m8p != m8:                                            # zero rows: no stats effect
        p8 = jnp.pad(p8, ((0, m8p - m8), (0, 0)))
    stats1 = conv1_stats_call(p8, w1big, tm8)                # (ga, 2, 512)
    stats1 = stats1.sum(0).reshape(2, 8, 64).sum(1)          # (2, 64): sum / sumsq (no bias)

    m1 = float(n * 196)
    b1 = params["b1"].astype(f32)
    sum_y = stats1[0] + m1 * b1
    sumsq_y = stats1[1] + 2.0 * b1 * stats1[0] + m1 * b1 * b1
    mean1 = sum_y / m1
    var1 = jnp.maximum(sumsq_y / m1 - mean1 * mean1, 0.0)
    scale1 = params["g1"].astype(f32) * lax.rsqrt(var1 + EPS)
    shift1 = params["be1"].astype(f32) + (b1 - mean1) * scale1
    s1_512 = jnp.tile(scale1, 8).reshape(1, 512).astype(f32)
    sh1_512 = jnp.tile(shift1, 8).reshape(1, 512).astype(f32)

    # ---- pass 2: fused conv1-apply + conv2 + BN2 partial stats --------------
    w2 = _prep_w2(params["w2"]).astype(bf16)                 # [2, 512, 128]
    b2 = params["b2"].reshape(1, 128).astype(f32)
    bn = _largest_divisor(n, 16)
    y2, stats2 = conv_fused_call(pz, w1big, s1_512, sh1_512, _mask_z(), w2, b2,
                                 _mask_out(), bn, n)         # [N*64,128] bf16, (gb,2,128)
    stats2 = stats2.sum(0)                                   # (2, 128)

    c2 = float(n * 49)
    mean2 = stats2[0] / c2
    var2 = jnp.maximum(stats2[1] / c2 - mean2 * mean2, 0.0)
    scale2 = params["g2"].astype(f32) * lax.rsqrt(var2 + EPS)
    shift2 = params["be2"].astype(f32) - mean2 * scale2

    # ---- epilogue: BN2 + ReLU + Linear(6272->1) + sigmoid --------------------
    wd = _prep_dense_weight(params["wd"]).astype(f32)        # [64, 128]
    bd = params["bd"].reshape(1, 1).astype(f32)
    bbe = _epilogue_block(n)
    return epilogue_call(y2, scale2.reshape(1, 128), shift2.reshape(1, 128),
                         wd, bd, bbe, n)                     # [N, 1]


# ----------------------------------------------------------------------------
# reference (pure f32 JAX, PyTorch semantics) and parameter init
# ----------------------------------------------------------------------------
def reference_forward(x, params):
    def bn(y, gamma, beta):
        mean = y.mean(axis=(0, 2, 3), keepdims=True)
        var = ((y - mean) ** 2).mean(axis=(0, 2, 3), keepdims=True)
        yh = (y - mean) * lax.rsqrt(var + EPS)
        return yh * gamma[None, :, None, None] + beta[None, :, None, None]

    dn = ("NCHW", "OIHW", "NCHW")
    y1 = lax.conv_general_dilated(x, params["w1"], (2, 2), ((1, 1), (1, 1)),
                                  dimension_numbers=dn)
    y1 = y1 + params["b1"][None, :, None, None]
    a1 = jnp.maximum(bn(y1, params["g1"], params["be1"]), 0.0)
    y2 = lax.conv_general_dilated(a1, params["w2"], (2, 2), ((1, 1), (1, 1)),
                                  dimension_numbers=dn)
    y2 = y2 + params["b2"][None, :, None, None]
    a2 = jnp.maximum(bn(y2, params["g2"], params["be2"]), 0.0)
    feat = a2.reshape(x.shape[0], 128 * 7 * 7)
    logit = feat @ params["wd"].T + params["bd"][None, :]
    return jax.nn.sigmoid(logit)


def init_params(key):
    ks = jax.random.split(key, 6)
    return {
        # conv1: Conv2d(1, 64, k=4, s=2, p=1)
        "w1": jax.random.normal(ks[0], (64, 1, 4, 4), jnp.float32) * 0.05,
        "b1": jax.random.normal(ks[1], (64,), jnp.float32) * 0.05,
        # conv2: Conv2d(64, 128, k=4, s=2, p=1)
        "w2": jax.random.normal(ks[2], (128, 64, 4, 4), jnp.float32) * 0.02,
        "b2": jax.random.normal(ks[3], (128,), jnp.float32) * 0.02,
        # dense1: Linear(128*7*7, 1)
        "wd": jax.random.normal(ks[4], (1, 128 * 7 * 7), jnp.float32) * 0.01,
        "bd": jax.random.normal(ks[5], (1,), jnp.float32) * 0.01,
        # BatchNorm affine params (PyTorch default init)
        "g1": jnp.ones((64,), jnp.float32),
        "be1": jnp.zeros((64,), jnp.float32),
        "g2": jnp.ones((128,), jnp.float32),
        "be2": jnp.zeros((128,), jnp.float32),
    }


if __name__ == "__main__":
    key = jax.random.PRNGKey(0)
    k_x, k_p = jax.random.split(key)

    # MNIST-shaped input implied by the 128*7*7 flatten: [batch, 1, 28, 28]
    x = jax.random.normal(k_x, (2, 1, 28, 28), jnp.float32)
    params = init_params(k_p)

    out = jax.block_until_ready(discriminator_forward(x, params))
    ref = jax.block_until_ready(reference_forward(x, params))

    assert out.shape == (2, 1), out.shape
    assert bool(jnp.all(jnp.isfinite(out)))
    assert bool(jnp.all((out >= 0.0) & (out <= 1.0)))
    assert bool(jnp.max(jnp.abs(out - ref)) < 3e-2), (out, ref)
    print("KERNEL_OK")
</pallas_src>

<mosaic_0001>
module attributes {stable_mosaic.version = 11 : i64} {
  func.func @conv1_stats_kernel(%arg0: i32, %arg1: memref<56x128xbf16, #tpu.memory_space<vmem>>, %arg2: memref<128x512xbf16, #tpu.memory_space<vmem>>, %arg3: memref<1x2x512xf32, #tpu.memory_space<vmem>>) attributes {dimension_semantics = [#tpu.dimension_semantics<parallel>], iteration_bounds = array<i64: 1>, scalar_prefetch = 0 : i64, scratch_operands = 0 : i64, tpu.core_type = #tpu.core_type<tc>, window_params = [{transform_indices = @transform_0, window_bounds = array<i64: 56, 128>}, {pipeline_mode = #tpu.pipeline_mode<synchronous>, transform_indices = @transform_1, window_bounds = array<i64: 128, 512>}, {transform_indices = @transform_2, window_bounds = array<i64: 1, 2, 512>}]} {
    %c0 = arith.constant 0 : index
    %c0_0 = arith.constant 0 : index
    %0 = vector.load %arg1[%c0, %c0_0] : memref<56x128xbf16, #tpu.memory_space<vmem>>, vector<56x128xbf16>
    %c0_1 = arith.constant 0 : index
    %c0_2 = arith.constant 0 : index
    %1 = vector.load %arg2[%c0_1, %c0_2] : memref<128x512xbf16, #tpu.memory_space<vmem>>, vector<128x512xbf16>
    %cst = arith.constant dense<0.000000e+00> : vector<56x512xf32>
    %2 = tpu.matmul %0, %1, %cst {dimension_numbers = #tpu.dot_dimension_numbers<[1], [0], [0], [1], [0, 0, 1, 1], [], []>} : vector<56x128xbf16>, vector<128x512xbf16>, vector<56x512xf32> -> vector<56x512xf32>
    %cst_3 = arith.constant dense<0.000000e+00> : vector<512xf32>
    %3 = vector.multi_reduction <add>, %2, %cst_3 [0] : vector<56x512xf32> to vector<512xf32>
    %4 = vector.shape_cast %3 : vector<512xf32> to vector<1x512xf32>
    %5 = arith.mulf %2, %2 : vector<56x512xf32>
    %cst_4 = arith.constant dense<0.000000e+00> : vector<512xf32>
    %6 = vector.multi_reduction <add>, %5, %cst_4 [0] : vector<56x512xf32> to vector<512xf32>
    %7 = vector.shape_cast %6 : vector<512xf32> to vector<1x512xf32>
    %8 = tpu.concatenate %4, %7 in 0 : vector<1x512xf32>, vector<1x512xf32> -> vector<2x512xf32>
    %9 = vector.shape_cast %8 : vector<2x512xf32> to vector<1x2x512xf32>
    %c0_5 = arith.constant 0 : index
    %c0_6 = arith.constant 0 : index
    %c0_7 = arith.constant 0 : index
    %10 = vector.load %arg3[%c0_5, %c0_6, %c0_7] : memref<1x2x512xf32, #tpu.memory_space<vmem>>, vector<1x2x512xf32>
    tpu.vector_store %arg3[%c0_5, %c0_6, %c0_7], %9 {strides = array<i32>} : memref<1x2x512xf32, #tpu.memory_space<vmem>>, vector<1x2x512xf32>,
    return
  }
  func.func @transform_0(%arg0: i32) -> (i32, i32) {
    %c0_i32 = arith.constant 0 : i32
    %c0_i32_0 = arith.constant 0 : i32
    return %arg0, %c0_i32 : i32, i32
  }
  func.func @transform_1(%arg0: i32) -> (i32, i32) {
    %c0_i32 = arith.constant 0 : i32
    %c0_i32_0 = arith.constant 0 : i32
    %c0_i32_1 = arith.constant 0 : i32
    return %c0_i32, %c0_i32_0 : i32, i32
  }
  func.func @transform_2(%arg0: i32) -> (i32, i32, i32) {
    %c0_i32 = arith.constant 0 : i32
    %c0_i32_0 = arith.constant 0 : i32
    %c0_i32_1 = arith.constant 0 : i32
    return %arg0, %c0_i32, %c0_i32_0 : i32, i32, i32
  }
}

module attributes {stable_mosaic.version = 11 : i64} {
  func.func @conv_fused_kernel(%arg0: i32, %arg1: memref<144x128xbf16, #tpu.memory_space<vmem>>, %arg2: memref<128x512xbf16, #tpu.memory_space<vmem>>, %arg3: memref<1x512xf32, #tpu.memory_space<vmem>>, %arg4: memref<1x512xf32, #tpu.memory_space<vmem>>, %arg5: memref<72x512xf32, #tpu.memory_space<vmem>>, %arg6: memref<2x512x128xbf16, #tpu.memory_space<vmem>>, %arg7: memref<1x128xf32, #tpu.memory_space<vmem>>, %arg8: memref<64x128xf32, #tpu.memory_space<vmem>>, %arg9: memref<128x128xbf16, #tpu.memory_space<vmem>>, %arg10: memref<1x2x128xf32, #tpu.memory_space<vmem>>) attributes {dimension_semantics = [#tpu.dimension_semantics<parallel>], iteration_bounds = array<i64: 1>, scalar_prefetch = 0 : i64, scratch_operands = 0 : i64, tpu.core_type = #tpu.core_type<tc>, window_params = [{transform_indices = @transform_0, window_bounds = array<i64: 144, 128>}, {pipeline_mode = #tpu.pipeline_mode<synchronous>, transform_indices = @transform_1, window_bounds = array<i64: 128, 512>}, {pipeline_mode = #tpu.pipeline_mode<synchronous>, transform_indices = @transform_2, window_bounds = array<i64: 1, 512>}, {pipeline_mode = #tpu.pipeline_mode<synchronous>, transform_indices = @transform_3, window_bounds = array<i64: 1, 512>}, {pipeline_mode = #tpu.pipeline_mode<synchronous>, transform_indices = @transform_4, window_bounds = array<i64: 72, 512>}, {pipeline_mode = #tpu.pipeline_mode<synchronous>, transform_indices = @transform_5, window_bounds = array<i64: 2, 512, 128>}, {pipeline_mode = #tpu.pipeline_mode<synchronous>, transform_indices = @transform_6, window_bounds = array<i64: 1, 128>}, {pipeline_mode = #tpu.pipeline_mode<synchronous>, transform_indices = @transform_7, window_bounds = array<i64: 64, 128>}, {transform_indices = @transform_8, window_bounds = array<i64: 128, 128>}, {transform_indices = @transform_9, window_bounds = array<i64: 1, 2, 128>}]} {
    %c0 = arith.constant 0 : index
    %c0_0 = arith.constant 0 : index
    %0 = vector.load %arg1[%c0, %c0_0] : memref<144x128xbf16, #tpu.memory_space<vmem>>, vector<144x128xbf16>
    %c0_1 = arith.constant 0 : index
    %c0_2 = arith.constant 0 : index
    %1 = vector.load %arg2[%c0_1, %c0_2] : memref<128x512xbf16, #tpu.memory_space<vmem>>, vector<128x512xbf16>
    %cst = arith.constant dense<0.000000e+00> : vector<144x512xf32>
    %2 = tpu.matmul %0, %1, %cst {dimension_numbers = #tpu.dot_dimension_numbers<[1], [0], [0], [1], [0, 0, 1, 1], [], []>} : vector<144x128xbf16>, vector<128x512xbf16>, vector<144x512xf32> -> vector<144x512xf32>
    %c0_3 = arith.constant 0 : index
    %c0_4 = arith.constant 0 : index
    %3 = vector.load %arg3[%c0_3, %c0_4] : memref<1x512xf32, #tpu.memory_space<vmem>>, vector<1x512xf32>
    %4 = vector.broadcast %3 : vector<1x512xf32> to vector<144x512xf32>
    %5 = arith.mulf %2, %4 : vector<144x512xf32>
    %c0_5 = arith.constant 0 : index
    %c0_6 = arith.constant 0 : index
    %6 = vector.load %arg4[%c0_5, %c0_6] : memref<1x512xf32, #tpu.memory_space<vmem>>, vector<1x512xf32>
    %7 = vector.broadcast %6 : vector<1x512xf32> to vector<144x512xf32>
    %8 = arith.addf %5, %7 : vector<144x512xf32>
    %cst_7 = arith.constant 0.000000e+00 : f32
    %9 = vector.broadcast %cst_7 : f32 to vector<144x512xf32>
    %10 = arith.maximumf %8, %9 : vector<144x512xf32>
    %11 = vector.shape_cast %10 : vector<144x512xf32> to vector<2x72x512xf32>
    %c0_8 = arith.constant 0 : index
    %c0_9 = arith.constant 0 : index
    %12 = vector.load %arg5[%c0_8, %c0_9] : memref<72x512xf32, #tpu.memory_space<vmem>>, vector<72x512xf32>
    %13 = vector.shape_cast %12 : vector<72x512xf32> to vector<1x72x512xf32>
    %14 = vector.broadcast %13 : vector<1x72x512xf32> to vector<2x72x512xf32>
    %15 = arith.mulf %11, %14 : vector<2x72x512xf32>
    %16 = vector.extract_strided_slice %15 {offsets = [0, 0, 0], sizes = [2, 64, 512], strides = [1, 1, 1]} : vector<2x72x512xf32> to vector<2x64x512xf32>
    %17 = vector.shape_cast %16 : vector<2x64x512xf32> to vector<128x512xf32>
    %18 = arith.truncf %17 : vector<128x512xf32> to vector<128x512xbf16>
    %19 = vector.extract_strided_slice %15 {offsets = [0, 8, 0], sizes = [2, 64, 512], strides = [1, 1, 1]} : vector<2x72x512xf32> to vector<2x64x512xf32>
    %20 = vector.shape_cast %19 : vector<2x64x512xf32> to vector<128x512xf32>
    %21 = arith.truncf %20 : vector<128x512xf32> to vector<128x512xbf16>
    %c0_10 = arith.constant 0 : index
    %c0_11 = arith.constant 0 : index
    %c0_12 = arith.constant 0 : index
    %22 = vector.load %arg6[%c0_10, %c0_11, %c0_12] : memref<2x512x128xbf16, #tpu.memory_space<vmem>>, vector<1x512x128xbf16>
    %23 = vector.shape_cast %22 : vector<1x512x128xbf16> to vector<512x128xbf16>
    %cst_13 = arith.constant dense<0.000000e+00> : vector<128x128xf32>
    %24 = tpu.matmul %18, %23, %cst_13 {dimension_numbers = #tpu.dot_dimension_numbers<[1], [0], [0], [1], [0, 0, 1, 1], [], []>} : vector<128x512xbf16>, vector<512x128xbf16>, vector<128x128xf32> -> vector<128x128xf32>
    %c1 = arith.constant 1 : index
    %c0_14 = arith.constant 0 : index
    %c0_15 = arith.constant 0 : index
    %25 = vector.load %arg6[%c1, %c0_14, %c0_15] : memref<2x512x128xbf16, #tpu.memory_space<vmem>>, vector<1x512x128xbf16>
    %26 = vector.shape_cast %25 : vector<1x512x128xbf16> to vector<512x128xbf16>
    %cst_16 = arith.constant dense<0.000000e+00> : vector<128x128xf32>
    %27 = tpu.matmul %21, %26, %cst_16 {dimension_numbers = #tpu.dot_dimension_numbers<[1], [0], [0], [1], [0, 0, 1, 1], [], []>} : vector<128x512xbf16>, vector<512x128xbf16>, vector<128x128xf32> -> vector<128x128xf32>
    %28 = arith.addf %24, %27 : vector<128x128xf32>
    %c0_17 = arith.constant 0 : index
    %c0_18 = arith.constant 0 : index
    %29 = vector.load %arg7[%c0_17, %c0_18] : memref<1x128xf32, #tpu.memory_space<vmem>>, vector<1x128xf32>
    %30 = vector.broadcast %29 : vector<1x128xf32> to vector<128x128xf32>
    %31 = arith.addf %28, %30 : vector<128x128xf32>
    %32 = arith.truncf %31 : vector<128x128xf32> to vector<128x128xbf16>
    %c0_19 = arith.constant 0 : index
    %c0_20 = arith.constant 0 : index
    %33 = vector.load %arg9[%c0_19, %c0_20] : memref<128x128xbf16, #tpu.memory_space<vmem>>, vector<128x128xbf16>
    tpu.vector_store %arg9[%c0_19, %c0_20], %32 {strides = array<i32>} : memref<128x128xbf16, #tpu.memory_space<vmem>>, vector<128x128xbf16>,
    %34 = vector.shape_cast %31 : vector<128x128xf32> to vector<2x64x128xf32>
    %c0_21 = arith.constant 0 : index
    %c0_22 = arith.constant 0 : index
    %35 = vector.load %arg8[%c0_21, %c0_22] : memref<64x128xf32, #tpu.memory_space<vmem>>, vector<64x128xf32>
    %36 = vector.shape_cast %35 : vector<64x128xf32> to vector<1x64x128xf32>
    %37 = vector.broadcast %36 : vector<1x64x128xf32> to vector<2x64x128xf32>
    %38 = arith.mulf %34, %37 : vector<2x64x128xf32>
    %39 = vector.shape_cast %38 : vector<2x64x128xf32> to vector<128x128xf32>
    %cst_23 = arith.constant dense<0.000000e+00> : vector<128xf32>
    %40 = vector.multi_reduction <add>, %39, %cst_23 [0] : vector<128x128xf32> to vector<128xf32>
    %41 = vector.shape_cast %40 : vector<128xf32> to vector<1x128xf32>
    %42 = arith.mulf %39, %31 : vector<128x128xf32>
    %cst_24 = arith.constant dense<0.000000e+00> : vector<128xf32>
    %43 = vector.multi_reduction <add>, %42, %cst_24 [0] : vector<128x128xf32> to vector<128xf32>
    %44 = vector.shape_cast %43 : vector<128xf32> to vector<1x128xf32>
    %45 = tpu.concatenate %41, %44 in 0 : vector<1x128xf32>, vector<1x128xf32> -> vector<2x128xf32>
    %46 = vector.shape_cast %45 : vector<2x128xf32> to vector<1x2x128xf32>
    %c0_25 = arith.constant 0 : index
    %c0_26 = arith.constant 0 : index
    %c0_27 = arith.constant 0 : index
    %47 = vector.load %arg10[%c0_25, %c0_26, %c0_27] : memref<1x2x128xf32, #tpu.memory_space<vmem>>, vector<1x2x128xf32>
    tpu.vector_store %arg10[%c0_25, %c0_26, %c0_27], %46 {strides = array<i32>} : memref<1x2x128xf32, #tpu.memory_space<vmem>>, vector<1x2x128xf32>,
    return
  }
  func.func @transform_0(%arg0: i32) -> (i32, i32) {
    %c0_i32 = arith.constant 0 : i32
    %c0_i32_0 = arith.constant 0 : i32
    return %arg0, %c0_i32 : i32, i32
  }
  func.func @transform_1(%arg0: i32) -> (i32, i32) {
    %c0_i32 = arith.constant 0 : i32
    %c0_i32_0 = arith.constant 0 : i32
    %c0_i32_1 = arith.constant 0 : i32
    return %c0_i32, %c0_i32_0 : i32, i32
  }
  func.func @transform_2(%arg0: i32) -> (i32, i32) {
    %c0_i32 = arith.constant 0 : i32
    %c0_i32_0 = arith.constant 0 : i32
    %c0_i32_1 = arith.constant 0 : i32
    return %c0_i32, %c0_i32_0 : i32, i32
  }
  func.func @transform_3(%arg0: i32) -> (i32, i32) {
    %c0_i32 = arith.constant 0 : i32
    %c0_i32_0 = arith.constant 0 : i32
    %c0_i32_1 = arith.constant 0 : i32
    return %c0_i32, %c0_i32_0 : i32, i32
  }
  func.func @transform_4(%arg0: i32) -> (i32, i32) {
    %c0_i32 = arith.constant 0 : i32
    %c0_i32_0 = arith.constant 0 : i32
    %c0_i32_1 = arith.constant 0 : i32
    return %c0_i32, %c0_i32_0 : i32, i32
  }
  func.func @transform_5(%arg0: i32) -> (i32, i32, i32) {
    %c0_i32 = arith.constant 0 : i32
    %c0_i32_0 = arith.constant 0 : i32
    %c0_i32_1 = arith.constant 0 : i32
    %c0_i32_2 = arith.constant 0 : i32
    return %c0_i32, %c0_i32_0, %c0_i32_1 : i32, i32, i32
  }
  func.func @transform_6(%arg0: i32) -> (i32, i32) {
    %c0_i32 = arith.constant 0 : i32
    %c0_i32_0 = arith.constant 0 : i32
    %c0_i32_1 = arith.constant 0 : i32
    return %c0_i32, %c0_i32_0 : i32, i32
  }
  func.func @transform_7(%arg0: i32) -> (i32, i32) {
    %c0_i32 = arith.constant 0 : i32
    %c0_i32_0 = arith.constant 0 : i32
    %c0_i32_1 = arith.constant 0 : i32
    return %c0_i32, %c0_i32_0 : i32, i32
  }
  func.func @transform_8(%arg0: i32) -> (i32, i32) {
    %c0_i32 = arith.constant 0 : i32
    %c0_i32_0 = arith.constant 0 : i32
    return %arg0, %c0_i32 : i32, i32
  }
  func.func @transform_9(%arg0: i32) -> (i32, i32, i32) {
    %c0_i32 = arith.constant 0 : i32
    %c0_i32_0 = arith.constant 0 : i32
    %c0_i32_1 = arith.constant 0 : i32
    return %arg0, %c0_i32, %c0_i32_0 : i32, i32, i32
  }
}

module attributes {stable_mosaic.version = 11 : i64} {
  func.func @bn2_dense_sigmoid_kernel(%arg0: i32, %arg1: memref<128x128xbf16, #tpu.memory_space<vmem>>, %arg2: memref<1x128xf32, #tpu.memory_space<vmem>>, %arg3: memref<1x128xf32, #tpu.memory_space<vmem>>, %arg4: memref<64x128xf32, #tpu.memory_space<vmem>>, %arg5: memref<1x1xf32, #tpu.memory_space<vmem>>, %arg6: memref<2x1xf32, #tpu.memory_space<vmem>>) attributes {dimension_semantics = [#tpu.dimension_semantics<parallel>], iteration_bounds = array<i64: 1>, scalar_prefetch = 0 : i64, scratch_operands = 0 : i64, tpu.core_type = #tpu.core_type<tc>, window_params = [{transform_indices = @transform_0, window_bounds = array<i64: 128, 128>}, {pipeline_mode = #tpu.pipeline_mode<synchronous>, transform_indices = @transform_1, window_bounds = array<i64: 1, 128>}, {pipeline_mode = #tpu.pipeline_mode<synchronous>, transform_indices = @transform_2, window_bounds = array<i64: 1, 128>}, {pipeline_mode = #tpu.pipeline_mode<synchronous>, transform_indices = @transform_3, window_bounds = array<i64: 64, 128>}, {pipeline_mode = #tpu.pipeline_mode<synchronous>, transform_indices = @transform_4, window_bounds = array<i64: 1, 1>}, {transform_indices = @transform_5, window_bounds = array<i64: 2, 1>}]} {
    %c0 = arith.constant 0 : index
    %c0_0 = arith.constant 0 : index
    %0 = vector.load %arg1[%c0, %c0_0] : memref<128x128xbf16, #tpu.memory_space<vmem>>, vector<128x128xbf16>
    %1 = arith.extf %0 : vector<128x128xbf16> to vector<128x128xf32>
    %c0_1 = arith.constant 0 : index
    %c0_2 = arith.constant 0 : index
    %2 = vector.load %arg2[%c0_1, %c0_2] : memref<1x128xf32, #tpu.memory_space<vmem>>, vector<1x128xf32>
    %3 = vector.broadcast %2 : vector<1x128xf32> to vector<128x128xf32>
    %4 = arith.mulf %1, %3 : vector<128x128xf32>
    %c0_3 = arith.constant 0 : index
    %c0_4 = arith.constant 0 : index
    %5 = vector.load %arg3[%c0_3, %c0_4] : memref<1x128xf32, #tpu.memory_space<vmem>>, vector<1x128xf32>
    %6 = vector.broadcast %5 : vector<1x128xf32> to vector<128x128xf32>
    %7 = arith.addf %4, %6 : vector<128x128xf32>
    %cst = arith.constant 0.000000e+00 : f32
    %8 = vector.broadcast %cst : f32 to vector<128x128xf32>
    %9 = arith.maximumf %7, %8 : vector<128x128xf32>
    %10 = vector.shape_cast %9 : vector<128x128xf32> to vector<2x64x128xf32>
    %c0_5 = arith.constant 0 : index
    %c0_6 = arith.constant 0 : index
    %11 = vector.load %arg4[%c0_5, %c0_6] : memref<64x128xf32, #tpu.memory_space<vmem>>, vector<64x128xf32>
    %12 = vector.shape_cast %11 : vector<64x128xf32> to vector<1x64x128xf32>
    %13 = vector.broadcast %12 : vector<1x64x128xf32> to vector<2x64x128xf32>
    %14 = arith.mulf %10, %13 : vector<2x64x128xf32>
    %cst_7 = arith.constant dense<0.000000e+00> : vector<2x64xf32>
    %15 = vector.multi_reduction <add>, %14, %cst_7 [2] : vector<2x64x128xf32> to vector<2x64xf32>
    %cst_8 = arith.constant dense<0.000000e+00> : vector<2xf32>
    %16 = vector.multi_reduction <add>, %15, %cst_8 [1] : vector<2x64xf32> to vector<2xf32>
    %17 = vector.shape_cast %16 : vector<2xf32> to vector<2x1xf32>
    %c0_9 = arith.constant 0 : index
    %c0_10 = arith.constant 0 : index
    %18 = vector.load %arg5[%c0_9, %c0_10] : memref<1x1xf32, #tpu.memory_space<vmem>>, vector<1x1xf32>
    %19 = vector.broadcast %18 : vector<1x1xf32> to vector<2x1xf32>
    %20 = arith.addf %17, %19 : vector<2x1xf32>
    %21 = math.absf %20 : vector<2x1xf32>
    %cst_11 = arith.constant 0.000000e+00 : f32
    %22 = vector.broadcast %cst_11 : f32 to vector<2x1xf32>
    %23 = arith.subf %22, %21 : vector<2x1xf32>
    %24 = math.exp %23 : vector<2x1xf32>
    %cst_12 = arith.constant 0.000000e+00 : f32
    %25 = vector.broadcast %cst_12 : f32 to vector<2x1xf32>
    %26 = arith.cmpf oge, %20, %25 : vector<2x1xf32>
    %cst_13 = arith.constant 1.000000e+00 : f32
    %27 = vector.broadcast %cst_13 : f32 to vector<2x1xf32>
    %28 = arith.addf %27, %24 : vector<2x1xf32>
    %cst_14 = arith.constant 1.000000e+00 : f32
    %29 = vector.broadcast %cst_14 : f32 to vector<2x1xf32>
    %30 = arith.divf %29, %28 : vector<2x1xf32>
    %cst_15 = arith.constant 1.000000e+00 : f32
    %31 = vector.broadcast %cst_15 : f32 to vector<2x1xf32>
    %32 = arith.addf %31, %24 : vector<2x1xf32>
    %33 = arith.divf %24, %32 : vector<2x1xf32>
    %34 = arith.select %26, %30, %33 : vector<2x1xi1>, vector<2x1xf32>
    %c0_16 = arith.constant 0 : index
    %c0_17 = arith.constant 0 : index
    %35 = vector.load %arg6[%c0_16, %c0_17] : memref<2x1xf32, #tpu.memory_space<vmem>>, vector<2x1xf32>
    tpu.vector_store %arg6[%c0_16, %c0_17], %34 {strides = array<i32>} : memref<2x1xf32, #tpu.memory_space<vmem>>, vector<2x1xf32>,
    return
  }
  func.func @transform_0(%arg0: i32) -> (i32, i32) {
    %c0_i32 = arith.constant 0 : i32
    %c0_i32_0 = arith.constant 0 : i32
    return %arg0, %c0_i32 : i32, i32
  }
  func.func @transform_1(%arg0: i32) -> (i32, i32) {
    %c0_i32 = arith.constant 0 : i32
    %c0_i32_0 = arith.constant 0 : i32
    %c0_i32_1 = arith.constant 0 : i32
    return %c0_i32, %c0_i32_0 : i32, i32
  }
  func.func @transform_2(%arg0: i32) -> (i32, i32) {
    %c0_i32 = arith.constant 0 : i32
    %c0_i32_0 = arith.constant 0 : i32
    %c0_i32_1 = arith.constant 0 : i32
    return %c0_i32, %c0_i32_0 : i32, i32
  }
  func.func @transform_3(%arg0: i32) -> (i32, i32) {
    %c0_i32 = arith.constant 0 : i32
    %c0_i32_0 = arith.constant 0 : i32
    %c0_i32_1 = arith.constant 0 : i32
    return %c0_i32, %c0_i32_0 : i32, i32
  }
  func.func @transform_4(%arg0: i32) -> (i32, i32) {
    %c0_i32 = arith.constant 0 : i32
    %c0_i32_0 = arith.constant 0 : i32
    %c0_i32_1 = arith.constant 0 : i32
    return %c0_i32, %c0_i32_0 : i32, i32
  }
  func.func @transform_5(%arg0: i32) -> (i32, i32) {
    %c0_i32 = arith.constant 0 : i32
    %c0_i32_0 = arith.constant 0 : i32
    return %arg0, %c0_i32 : i32, i32
  }
}

</mosaic_0001>

<bundles_post_ra>
// kernel: tile.13
= control target key start
LH: loop header
LB: loop body
LE: loop exit
PB: predicated region body
PF: predicated region fallthrough
CT: control target
= control target key end

     0   :  { %s22_s0 = inlined_call_operand.vmem [shape: f32[64], index: 0, kind: input, shape index: {}]   ;;  %s23_s1 = inlined_call_operand.vmem [shape: f32[8,64], index: 1, kind: output, shape index: {}]  }
   0x1   :  { %v4_v0 = vld [vmem:[%s22_s0] ss:$0 sm:$0xff] }
   0x2   :  { %5 = vst [vmem:[%s23_s1] sm:$0xff] %v4_v0 }

// kernel: tile.14
= control target key start
LH: loop header
LB: loop body
LE: loop exit
PB: predicated region body
PF: predicated region fallthrough
CT: control target
= control target key end

     0   :  { %vm3_vm0 = vcmask 523264   ;;  %s46_s8 = smov 64   ;;  %vm9_vm1 = vcmask 1048064   ;;  %s75_s0 = inlined_call_operand.vmem [shape: f32[8,64], index: 0, kind: input, shape index: {}]   ;;  %s76_s1 = inlined_call_operand.vmem [shape: f32[1,512], index: 1, kind: output, shape index: {}]  }
   0x1   :  { %v41_v0 = vld [vmem:[%s75_s0 + $0x1] ss:$2 sm:$0xf]   ;;  %v2_v1 = vld [vmem:[%s75_s0] ss:$2 sm:$0xf]  }
   0x2   :  { %7 = vrot.lane.b32.xlu0 %v41_v0, %s46_s8  ;;  %4 = vst.msk [vmem:[#allocation0] ss:$8 sm:$0xf] %vm3_vm0, %v2_v1  }
  0x74   :  { %v8_v2 = vpop.permute.xlu0 %7  }
  0x75   :  { %10 = vst.msk [vmem:[#allocation0] ss:$8 sm:$0xf] %vm9_vm1, %v8_v2  }
  0x7c   :  { %v15_v3 = vld [vmem:[#allocation0] sm:$0x1]  ;;  %v20_v4 = vld [vmem:[#allocation0 + $0x8] sm:$0x1]  ;;  %v26_v5 = vld [vmem:[#allocation0 + $0x10] sm:$0x1] }
  0x7d   :  { %18 = vst [vmem:[%s76_s1] sm:$0x1] %v15_v3  ;;  %42 = vst [vmem:[%s76_s1 + $0x1] sm:$0x1] %v20_v4  ;;  %v33_v6 = vld [vmem:[#allocation0 + $0x18] sm:$0x1] }
  0x7e   :  { %43 = vst [vmem:[%s76_s1 + $0x2] sm:$0x1] %v26_v5  ;;  %44 = vst [vmem:[%s76_s1 + $0x3] sm:$0x1] %v33_v6 }

// kernel: discriminator_forward.3
= control target key start
LH: loop header
LB: loop body
LE: loop exit
PB: predicated region body
PF: predicated region fallthrough
CT: control target
= control target key end

     0   :  { %v621_v1 = vmov 0   ;;  %vm499_vm0 = vcmask 1040384   ;;  %s757_s1 = inlined_call_operand.vmem [shape: bf16[128,512], index: 1, kind: input, shape index: {}]   ;;  %s758_s0 = inlined_call_operand.vmem [shape: bf16[56,128], index: 0, kind: input, shape index: {}]   ;;  %s759_s2 = inlined_call_operand.vmem [shape: f32[1,2,512], index: 2, kind: output, shape index: {}]  }
   0x1   :  { %v569_v0 = vld [vmem:[%s757_s1 + $0xe4] ss:$16 sps:$4 sm:$0xff]   ;;  %265 = vmatprep.mubr.bf16.mxu0 %v621_v1  ;;  %336 = vmatprep.mubr.bf16.mxu1 %v621_v1  ;;  %v571_v2 = vld [vmem:[%s757_s1 + $0xec] ss:$16 sps:$4 sm:$0xff]   ;;  %v573_v3 = vld [vmem:[%s757_s1 + $0xe0] ss:$16 sps:$4 sm:$0xff]  }
   0x2   :  { %233 = vmatprep.subr.bf16.mxu0 %v569_v0  ;;  %v574_v4 = vld [vmem:[%s757_s1 + $0xe8] ss:$16 sps:$4 sm:$0xff]   ;;  %304 = vmatprep.subr.bf16.mxu1 %v571_v2  ;;  %v575_v5 = vld [vmem:[%s757_s1 + $0xc4] ss:$16 sps:$4 sm:$0xff]   ;;  %v577_v6 = vld [vmem:[%s757_s1 + $0xcc] ss:$16 sps:$4 sm:$0xff]  }
   0x3   :  { %234 = vmatpush1.bf16.msra.mxu0 %v573_v3  ;;  %305 = vmatpush1.bf16.msra.mxu1 %v574_v4  ;;  %v579_v7 = vld [vmem:[%s757_s1 + $0xc0] ss:$16 sps:$4 sm:$0xff]   ;;  %v580_v8 = vld [vmem:[%s757_s1 + $0xc8] ss:$16 sps:$4 sm:$0xff]   ;;  %v581_v9 = vld [vmem:[%s757_s1 + $0xa4] ss:$16 sps:$4 sm:$0xff]  }
   0x4   :  { %235 = vmatprep.subr.bf16.mxu0 %v575_v5  ;;  %306 = vmatprep.subr.bf16.mxu1 %v577_v6  ;;  %v583_v10 = vld [vmem:[%s757_s1 + $0xac] ss:$16 sps:$4 sm:$0xff]   ;;  %v585_v11 = vld [vmem:[%s757_s1 + $0xa0] ss:$16 sps:$4 sm:$0xff]   ;;  %v586_v12 = vld [vmem:[%s757_s1 + $0xa8] ss:$16 sps:$4 sm:$0xff]  }
   0x5   :  { %v587_v13 = vld [vmem:[%s757_s1 + $0x84] ss:$16 sps:$4 sm:$0xff]   ;;  %v589_v14 = vld [vmem:[%s757_s1 + $0x8c] ss:$16 sps:$4 sm:$0xff]   ;;  %v591_v15 = vld [vmem:[%s757_s1 + $0x80] ss:$16 sps:$4 sm:$0xff]  }
   0x6   :  { %v592_v16 = vld [vmem:[%s757_s1 + $0x88] ss:$16 sps:$4 sm:$0xff]   ;;  %v593_v17 = vld [vmem:[%s757_s1 + $0x64] ss:$16 sps:$4 sm:$0xff]   ;;  %v595_v18 = vld [vmem:[%s757_s1 + $0x6c] ss:$16 sps:$4 sm:$0xff]  }
   0x7   :  { %236 = vmatpush1.bf16.msra.mxu0 %v579_v7  ;;  %307 = vmatpush1.bf16.msra.mxu1 %v580_v8  ;;  %v597_v19 = vld [vmem:[%s757_s1 + $0x60] ss:$16 sps:$4 sm:$0xff]   ;;  %v598_v20 = vld [vmem:[%s757_s1 + $0x68] ss:$16 sps:$4 sm:$0xff]   ;;  %v599_v21 = vld [vmem:[%s757_s1 + $0x44] ss:$16 sps:$4 sm:$0xff]  }
   0x8   :  { %237 = vmatprep.subr.bf16.mxu0 %v581_v9  ;;  %308 = vmatprep.subr.bf16.mxu1 %v583_v10  ;;  %v601_v22 = vld [vmem:[%s757_s1 + $0x4c] ss:$16 sps:$4 sm:$0xff]   ;;  %v603_v23 = vld [vmem:[%s757_s1 + $0x40] ss:$16 sps:$4 sm:$0xff]   ;;  %v604_v24 = vld [vmem:[%s757_s1 + $0x48] ss:$16 sps:$4 sm:$0xff]  }
   0x9   :  { %v605_v25 = vld [vmem:[%s757_s1 + $0x24] ss:$16 sps:$4 sm:$0xff]   ;;  %v607_v26 = vld [vmem:[%s757_s1 + $0x2c] ss:$16 sps:$4 sm:$0xff]   ;;  %v609_v27 = vld [vmem:[%s757_s1 + $0x20] ss:$16 sps:$4 sm:$0xff]  }
   0xa   :  { %v610_v28 = vld [vmem:[%s757_s1 + $0x28] ss:$16 sps:$4 sm:$0xff]   ;;  %v611_v29 = vld [vmem:[%s757_s1 + $0x4] ss:$16 sps:$4 sm:$0xff]   ;;  %v613_v30 = vld [vmem:[%s757_s1 + $0xc] ss:$16 sps:$4 sm:$0xff]  }
   0xb   :  { %238 = vmatpush1.bf16.msra.mxu0 %v585_v11  ;;  %309 = vmatpush1.bf16.msra.mxu1 %v586_v12  ;;  %v615_v31 = vld [vmem:[%s757_s1] ss:$16 sps:$4 sm:$0xff]   ;;  %v616_v32 = vld [vmem:[%s757_s1 + $0x8] ss:$16 sps:$4 sm:$0xff]  }
   0xc   :  { %239 = vmatprep.subr.bf16.mxu0 %v587_v13  ;;  %310 = vmatprep.subr.bf16.mxu1 %v589_v14  ;;  %v617_v33 = vld [vmem:[%s758_s0] sm:$0xff]   ;;  %v618_v34 = vld [vmem:[%s758_s0 + $0x8] sm:$0xff]   ;;  %v619_v35 = vld [vmem:[%s758_s0 + $0x10] sm:$0xff]  }
   0xd   :  { %v620_v36 = vld [vmem:[%s758_s0 + $0x18] ss:$0 sps:$4 sm:$0xff]  }
   0xf   :  { %240 = vmatpush1.bf16.msra.mxu0 %v591_v15  ;;  %311 = vmatpush1.bf16.msra.mxu1 %v592_v16 }
  0x10   :  { %241 = vmatprep.subr.bf16.mxu0 %v593_v17  ;;  %312 = vmatprep.subr.bf16.mxu1 %v595_v18 }
  0x13   :  { %242 = vmatpush1.bf16.msra.mxu0 %v597_v19  ;;  %313 = vmatpush1.bf16.msra.mxu1 %v598_v20 }
  0x14   :  { %243 = vmatprep.subr.bf16.mxu0 %v599_v21  ;;  %314 = vmatprep.subr.bf16.mxu1 %v601_v22 }
  0x17   :  { %244 = vmatpush1.bf16.msra.mxu0 %v603_v23  ;;  %315 = vmatpush1.bf16.msra.mxu1 %v604_v24 }
  0x18   :  { %245 = vmatprep.subr.bf16.mxu0 %v605_v25  ;;  %316 = vmatprep.subr.bf16.mxu1 %v607_v26 }
  0x1b   :  { %246 = vmatpush1.bf16.msra.mxu0 %v609_v27  ;;  %317 = vmatpush1.bf16.msra.mxu1 %v610_v28 }
  0x1c   :  { %247 = vmatprep.subr.bf16.mxu0 %v611_v29  ;;  %318 = vmatprep.subr.bf16.mxu1 %v613_v30 }
  0x1f   :  { %248 = vmatpush1.bf16.msra.mxu0 %v615_v31  ;;  %319 = vmatpush1.bf16.msra.mxu1 %v616_v32 }
  0x22   :  { %266 = vmatmul.mubr.bf16.vlgmr.msra.gmra.mxu0 %v617_v33  ;;  %337 = vmatmul.mubr.bf16.vlgmr.msra.gmra.mxu1 %v617_v33 }
  0x23   :  { %275 = vmatprep.mubr.bf16.mxu0 %v621_v1  ;;  %346 = vmatprep.mubr.bf16.mxu1 %v621_v1 }
  0x2a   :  { %276 = vmatmul.mubr.bf16.gmra.mxu0 %v618_v34  ;;  %347 = vmatmul.mubr.bf16.gmra.mxu1 %v618_v34 }
  0x2b   :  { %285 = vmatprep.mubr.bf16.mxu0 %v621_v1  ;;  %356 = vmatprep.mubr.bf16.mxu1 %v621_v1 }
  0x32   :  { %286 = vmatmul.mubr.bf16.gmra.mxu0 %v619_v35  ;;  %357 = vmatmul.mubr.bf16.gmra.mxu1 %v619_v35 }
  0x33   :  { %295 = vmatprep.mubr.bf16.mxu0 %v621_v1  ;;  %366 = vmatprep.mubr.bf16.mxu1 %v621_v1 }
  0x3a   :  { %296 = vmatmul.mubr.bf16.gmra.mxu0 %v620_v36  ;;  %367 = vmatmul.mubr.bf16.gmra.mxu1 %v620_v36 }
  0xe2   :  { %v267_v37 = vpop.f32.mrf.mxu0  ;;  %v338_v38 = vpop.f32.mrf.mxu1 }
  0xe3   :  { %v423_v49 = vmul.f32 %v267_v37, %v267_v37  ;;  %v425_v53 = vmul.f32 %v338_v38, %v338_v38 }
  0xe4   :  { %v269_v39 = vpop.f32.mrf.mxu0  ;;  %v340_v40 = vpop.f32.mrf.mxu1 }
  0xe5   :  { %v424_v54 = vmul.f32 %v269_v39, %v269_v39  ;;  %v426_v57 = vmul.f32 %v340_v40, %v340_v40 }
  0xe6   :  { %v271_v41 = vpop.f32.mrf.mxu0  ;;  %v342_v42 = vpop.f32.mrf.mxu1 }
  0xe7   :  { %v427_v45 = vmul.f32 %v271_v41, %v271_v41  ;;  %v429_v48 = vmul.f32 %v342_v42, %v342_v42  ;;  %v375_v58 = vadd.f32 %v271_v41, %v267_v37  ;;  %v399_v60 = vadd.f32 %v342_v42, %v338_v38 }
  0xe8   :  { %v273_v43 = vpop.f32.mrf.mxu0  ;;  %v344_v44 = vpop.f32.mrf.mxu1 }
  0xe9   :  { %v428_v50 = vmul.f32 %v273_v43, %v273_v43  ;;  %v430_v55 = vmul.f32 %v344_v44, %v344_v44  ;;  %v451_v59 = vadd.f32 %v427_v45, %v423_v49  ;;  %v475_v63 = vadd.f32 %v429_v48, %v425_v53 }
  0xea   :  { %v277_v46 = vpop.f32.mrf.mxu0  ;;  %v348_v47 = vpop.f32.mrf.mxu1  ;;  %v387_v0 = vadd.f32 %v273_v43, %v269_v39  ;;  %v411_v4 = vadd.f32 %v344_v44, %v340_v40 }
  0xeb   :  { %v431_v56 = vmul.f32 %v277_v46, %v277_v46  ;;  %v433_v1 = vmul.f32 %v348_v47, %v348_v47  ;;  %v463_v3 = vadd.f32 %v428_v50, %v424_v54  ;;  %v376_v5 = vadd.f32 %v375_v58, %v277_v46 }
  0xec   :  { %v279_v51 = vpop.f32.mrf.mxu0  ;;  %v350_v52 = vpop.f32.mrf.mxu1  ;;  %v487_v9 = vadd.f32 %v430_v55, %v426_v57  ;;  %v400_v11 = vadd.f32 %v399_v60, %v348_v47 }
  0xed   :  { %v432_v2 = vmul.f32 %v279_v51, %v279_v51  ;;  %v434_v6 = vmul.f32 %v350_v52, %v350_v52  ;;  %v452_v10 = vadd.f32 %v451_v59, %v431_v56  ;;  %v388_v13 = vadd.f32 %v387_v0, %v279_v51 }
  0xee   :  { %v281_v61 = vpop.f32.mrf.mxu0  ;;  %v352_v62 = vpop.f32.mrf.mxu1  ;;  %v412_v14 = vadd.f32 %v411_v4, %v350_v52  ;;  %v476_v19 = vadd.f32 %v475_v63, %v433_v1 }
  0xef   :  { %v435_v12 = vmul.f32 %v281_v61, %v281_v61  ;;  %v437_v15 = vmul.f32 %v352_v62, %v352_v62  ;;  %v464_v20 = vadd.f32 %v463_v3, %v432_v2  ;;  %v488_v23 = vadd.f32 %v487_v9, %v434_v6 }
  0xf0   :  { %v283_v7 = vpop.f32.mrf.mxu0  ;;  %v354_v8 = vpop.f32.mrf.mxu1  ;;  %v377_v24 = vadd.f32 %v376_v5, %v281_v61  ;;  %v401_v25 = vadd.f32 %v400_v11, %v352_v62 }
  0xf1   :  { %v436_v16 = vmul.f32 %v283_v7, %v283_v7  ;;  %v438_v21 = vmul.f32 %v354_v8, %v354_v8  ;;  %v453_v29 = vadd.f32 %v452_v10, %v435_v12  ;;  %v389_v30 = vadd.f32 %v388_v13, %v283_v7 }
  0xf2   :  { %v287_v17 = vpop.f32.mrf.mxu0  ;;  %v358_v18 = vpop.f32.mrf.mxu1  ;;  %v413_v31 = vadd.f32 %v412_v14, %v354_v8  ;;  %v477_v33 = vadd.f32 %v476_v19, %v437_v15 }
  0xf3   :  { %v439_v22 = vmul.f32 %v287_v17, %v287_v17  ;;  %v441_v26 = vmul.f32 %v358_v18, %v358_v18  ;;  %v465_v34 = vadd.f32 %v464_v20, %v436_v16  ;;  %v378_v35 = vadd.f32 %v377_v24, %v287_v17 }
  0xf4   :  { %v289_v27 = vpop.f32.mrf.mxu0  ;;  %v360_v28 = vpop.f32.mrf.mxu1  ;;  %v489_v39 = vadd.f32 %v488_v23, %v438_v21  ;;  %v402_v41 = vadd.f32 %v401_v25, %v358_v18 }
  0xf5   :  { %v440_v32 = vmul.f32 %v289_v27, %v289_v27  ;;  %v442_v36 = vmul.f32 %v360_v28, %v360_v28  ;;  %v454_v40 = vadd.f32 %v453_v29, %v439_v22  ;;  %v478_v43 = vadd.f32 %v477_v33, %v441_v26 }
  0xf6   :  { %v291_v37 = vpop.f32.mrf.mxu0  ;;  %v362_v38 = vpop.f32.mrf.mxu1  ;;  %v390_v44 = vadd.f32 %v389_v30, %v289_v27  ;;  %v414_v45 = vadd.f32 %v413_v31, %v360_v28 }
  0xf7   :  { %v443_v42 = vmul.f32 %v291_v37, %v291_v37  ;;  %v445_v46 = vmul.f32 %v362_v38, %v362_v38  ;;  %v466_v49 = vadd.f32 %v465_v34, %v440_v32  ;;  %v379_v50 = vadd.f32 %v378_v35, %v291_v37 }
  0xf8   :  { %v293_v47 = vpop.f32.mrf.mxu0  ;;  %v364_v48 = vpop.f32.mrf.mxu1  ;;  %v403_v51 = vadd.f32 %v402_v41, %v362_v38  ;;  %v490_v53 = vadd.f32 %v489_v39, %v442_v36 }
  0xf9   :  { %v444_v52 = vmul.f32 %v293_v47, %v293_v47  ;;  %v455_v54 = vadd.f32 %v454_v40, %v443_v42  ;;  %v391_v55 = vadd.f32 %v390_v44, %v293_v47  ;;  %v446_v56 = vmul.f32 %v364_v48, %v364_v48 }
  0xfa   :  { %v297_v57 = vpop.f32.mrf.mxu0  ;;  %v368_v58 = vpop.f32.mrf.mxu1  ;;  %v415_v59 = vadd.f32 %v414_v45, %v364_v48  ;;  %v479_v63 = vadd.f32 %v478_v43, %v445_v46  ;;  %v622_v43 = vmov 1983009808   ;;  %v513_v45 = vlaneseq }
  0xfb   :  { %v380_v60 = vadd.f32 %v379_v50, %v297_v57  ;;  %v447_v61 = vmul.f32 %v297_v57, %v297_v57  ;;  %v404_v62 = vadd.f32 %v403_v51, %v368_v58  ;;  %v467_v0 = vadd.f32 %v466_v49, %v444_v52 }
  0xfc   :  { %v491_v1 = vadd.f32 %v490_v53, %v446_v56  ;;  %v449_v2 = vmul.f32 %v368_v58, %v368_v58  ;;  %v299_v3 = vpop.f32.mrf.mxu0  ;;  %v370_v4 = vpop.f32.mrf.mxu1  ;;  %v511_v44 = vunpack.c.l.s4 %v622_v43 }
  0xfd   :  { %v381_v5 = vrot.slane %v380_v60, 4  ;;  %v456_v6 = vadd.f32 %v455_v54, %v447_v61  ;;  %v405_v7 = vrot.slane %v404_v62, 4  ;;  %v392_v8 = vadd.f32 %v391_v55, %v299_v3 }
  0xfe   :  { %v480_v9 = vadd.f32 %v479_v63, %v449_v2  ;;  %v448_v10 = vmul.f32 %v299_v3, %v299_v3  ;;  %v416_v11 = vadd.f32 %v415_v59, %v370_v4  ;;  %v450_v12 = vmul.f32 %v370_v4, %v370_v4  ;;  %v301_v13 = vpop.f32.mrf.mxu0  ;;  %v372_v14 = vpop.f32.mrf.mxu1 }
  0xff   :  { %v382_v15 = vadd.f32 %v381_v5, %v380_v60  ;;  %v457_v16 = vrot.slane %v456_v6, 4  ;;  %v406_v17 = vadd.f32 %v405_v7, %v404_v62  ;;  %v393_v18 = vrot.slane %v392_v8, 4 }
 0x100   :  { %v481_v19 = vrot.slane %v480_v9, 4  ;;  %v468_v20 = vadd.f32 %v467_v0, %v448_v10  ;;  %v417_v21 = vrot.slane %v416_v11, 4  ;;  %v492_v22 = vadd.f32 %v491_v1, %v450_v12  ;;  %v302_v23 = vpop.f32.mrf.mxu0  ;;  %v373_v24 = vpop.f32.mrf.mxu1 }
 0x101   :  { %v383_v25 = vrot.slane %v382_v15, 2  ;;  %v458_v26 = vadd.f32 %v457_v16, %v456_v6  ;;  %v407_v27 = vrot.slane %v406_v17, 2  ;;  %v394_v28 = vadd.f32 %v393_v18, %v392_v8 }
 0x102   :  { %v482_v29 = vadd.f32 %v481_v19, %v480_v9  ;;  %v469_v30 = vrot.slane %v468_v20, 4  ;;  %v418_v31 = vadd.f32 %v417_v21, %v416_v11  ;;  %v493_v32 = vrot.slane %v492_v22, 4 }
 0x103   :  { %v384_v33 = vadd.f32 %v383_v25, %v382_v15  ;;  %v459_v34 = vrot.slane %v458_v26, 2  ;;  %v408_v35 = vadd.f32 %v407_v27, %v406_v17  ;;  %v395_v36 = vrot.slane %v394_v28, 2 }
 0x104   :  { %v483_v37 = vrot.slane %v482_v29, 2  ;;  %v470_v38 = vadd.f32 %v469_v30, %v468_v20  ;;  %v419_v39 = vrot.slane %v418_v31, 2  ;;  %v494_v40 = vadd.f32 %v493_v32, %v492_v22 }
 0x105   :  { %v460_v41 = vadd.f32 %v459_v34, %v458_v26  ;;  %v396_v42 = vadd.f32 %v395_v36, %v394_v28  ;;  %v385_v50 = vrot.slane %v384_v33, 1  ;;  %v409_v52 = vrot.slane %v408_v35, 1 }
 0x106   :  { %v484_v46 = vadd.f32 %v483_v37, %v482_v29  ;;  %v471_v47 = vrot.slane %v470_v38, 2  ;;  %v420_v48 = vadd.f32 %v419_v39, %v418_v31  ;;  %v495_v49 = vrot.slane %v494_v40, 2 }
 0x107   :  { %v461_v51 = vrot.slane %v460_v41, 1  ;;  %v397_v53 = vrot.slane %v396_v42, 1  ;;  %v512_v58 = vunpack.c.0.s8 %v511_v44  ;;  %v514_v59 = vshrl.u32 %v513_v45, 7 }
 0x108   :  { %v485_v54 = vrot.slane %v484_v46, 1  ;;  %v472_v55 = vadd.f32 %v471_v47, %v470_v38  ;;  %v421_v56 = vrot.slane %v420_v48, 1  ;;  %v496_v57 = vadd.f32 %v495_v49, %v494_v40 }
 0x109   :  { %v462_v60 = vadd.f32 %v461_v51, %v460_v41  ;;  %v386_v0 = vadd.f32 %v385_v50, %v384_v33  ;;  %v410_v1 = vadd.f32 %v409_v52, %v408_v35  ;;  %v398_v2 = vadd.f32 %v397_v53, %v396_v42 }
 0x10a   :  { %v486_v61 = vadd.f32 %v485_v54, %v484_v46  ;;  %v473_v62 = vrot.slane %v472_v55, 1  ;;  %v497_v63 = vrot.slane %v496_v57, 1  ;;  %v422_v4 = vadd.f32 %v421_v56, %v420_v48 }
 0x10b   :  { %v515_v6 = vsub.s32 %v512_v58, %v514_v59  ;;  %v500_v7 = vsel %vm499_vm0, %v386_v0, %v462_v60 }
 0x10c   :  { %v474_v3 = vadd.f32 %v473_v62, %v472_v55  ;;  %v498_v5 = vadd.f32 %v497_v63, %v496_v57  ;;  %v502_v8 = vsel %vm499_vm0, %v410_v1, %v486_v61 }
 0x10e   :  { %v501_v9 = vsel %vm499_vm0, %v398_v2, %v474_v3  ;;  %v503_v10 = vsel %vm499_vm0, %v422_v4, %v498_v5 }
 0x10f   :  { %v508_v11 = vcombine.low %v500_v7, %v501_v9  ;;  %v509_v12 = vcombine.low %v502_v8, %v503_v10 }
 0x111   :  { %v516_v13 = vrot.slane %v508_v11, %v515_v6  ;;  %v523_v14 = vrot.slane %v509_v12, %v515_v6 }
 0x113   :  { %v524_v15 = vcombine.low %v516_v13, %v523_v14 }
 0x115   :  { %526 = vst [vmem:[%s759_s2] sm:$0xff] %v524_v15 }

// kernel: discriminator_forward.4
= control target key start
LH: loop header
LB: loop body
LE: loop exit
PB: predicated region body
PF: predicated region fallthrough
CT: control target
= control target key end

     0   :  { %v2698_v1 = vmov 0   ;;  %vm2060_vm0 = vcmask 1040384   ;;  %s4020_s1 = inlined_call_operand.vmem [shape: bf16[128,512], index: 1, kind: input, shape index: {}]   ;;  %s4021_s0 = inlined_call_operand.vmem [shape: bf16[144,128], index: 0, kind: input, shape index: {}]   ;;  %s4022_s5 = inlined_call_operand.vmem [shape: bf16[2,512,128], index: 5, kind: input, shape index: {}]   ;;  %s4023_s2 = inlined_call_operand.vmem [shape: f32[1,512], index: 2, kind: input, shape index: {}]   ;;  %s4024_s3 = inlined_call_operand.vmem [shape: f32[1,512], index: 3, kind: input, shape index: {}]   ;;  %s4025_s4 = inlined_call_operand.vmem [shape: f32[72,512], index: 4, kind: input, shape index: {}]   ;;  %s4026_s6 = inlined_call_operand.vmem [shape: f32[1,128], index: 6, kind: input, shape index: {}]   ;;  %s4027_s7 = inlined_call_operand.vmem [shape: f32[64,128], index: 7, kind: input, shape index: {}]   ;;  %s4028_s8 = inlined_call_operand.vmem [shape: bf16[128,128], index: 8, kind: output, shape index: {0}]   ;;  %s4029_s9 = inlined_call_operand.vmem [shape: f32[1,2,128], index: 9, kind: output, shape index: {1}]  }
   0x1   :  { %v2577_v0 = vld [vmem:[%s4020_s1 + $0xe4] ss:$16 sps:$4 sm:$0xff]   ;;  %328 = vmatprep.mubr.bf16.mxu0 %v2698_v1  ;;  %451 = vmatprep.mubr.bf16.mxu1 %v2698_v1  ;;  %v2579_v2 = vld [vmem:[%s4020_s1 + $0xec] ss:$16 sps:$4 sm:$0xff]   ;;  %v2581_v3 = vld [vmem:[%s4020_s1 + $0xe0] ss:$16 sps:$4 sm:$0xff]  }
   0x2   :  { %296 = vmatprep.subr.bf16.mxu0 %v2577_v0  ;;  %v2582_v4 = vld [vmem:[%s4020_s1 + $0xe8] ss:$16 sps:$4 sm:$0xff]   ;;  %419 = vmatprep.subr.bf16.mxu1 %v2579_v2  ;;  %v2583_v5 = vld [vmem:[%s4020_s1 + $0xc4] ss:$16 sps:$4 sm:$0xff]   ;;  %v2585_v6 = vld [vmem:[%s4020_s1 + $0xcc] ss:$16 sps:$4 sm:$0xff]  }
   0x3   :  { %297 = vmatpush1.bf16.msra.mxu0 %v2581_v3  ;;  %420 = vmatpush1.bf16.msra.mxu1 %v2582_v4  ;;  %v2587_v7 = vld [vmem:[%s4020_s1 + $0xc0] ss:$16 sps:$4 sm:$0xff]   ;;  %v2588_v8 = vld [vmem:[%s4020_s1 + $0xc8] ss:$16 sps:$4 sm:$0xff]   ;;  %v2589_v9 = vld [vmem:[%s4020_s1 + $0xa4] ss:$16 sps:$4 sm:$0xff]  }
   0x4   :  { %298 = vmatprep.subr.bf16.mxu0 %v2583_v5  ;;  %421 = vmatprep.subr.bf16.mxu1 %v2585_v6  ;;  %v2591_v10 = vld [vmem:[%s4020_s1 + $0xac] ss:$16 sps:$4 sm:$0xff]   ;;  %v2593_v11 = vld [vmem:[%s4020_s1 + $0xa0] ss:$16 sps:$4 sm:$0xff]   ;;  %v2594_v12 = vld [vmem:[%s4020_s1 + $0xa8] ss:$16 sps:$4 sm:$0xff]  }
   0x5   :  { %v2595_v13 = vld [vmem:[%s4020_s1 + $0x84] ss:$16 sps:$4 sm:$0xff]   ;;  %v2597_v14 = vld [vmem:[%s4020_s1 + $0x8c] ss:$16 sps:$4 sm:$0xff]   ;;  %v2599_v15 = vld [vmem:[%s4020_s1 + $0x80] ss:$16 sps:$4 sm:$0xff]  }
   0x6   :  { %v2600_v16 = vld [vmem:[%s4020_s1 + $0x88] ss:$16 sps:$4 sm:$0xff]   ;;  %v2601_v17 = vld [vmem:[%s4020_s1 + $0x64] ss:$16 sps:$4 sm:$0xff]   ;;  %v2603_v18 = vld [vmem:[%s4020_s1 + $0x6c] ss:$16 sps:$4 sm:$0xff]  }
   0x7   :  { %299 = vmatpush1.bf16.msra.mxu0 %v2587_v7  ;;  %422 = vmatpush1.bf16.msra.mxu1 %v2588_v8  ;;  %v2605_v19 = vld [vmem:[%s4020_s1 + $0x60] ss:$16 sps:$4 sm:$0xff]   ;;  %v2606_v20 = vld [vmem:[%s4020_s1 + $0x68] ss:$16 sps:$4 sm:$0xff]   ;;  %v2607_v21 = vld [vmem:[%s4020_s1 + $0x44] ss:$16 sps:$4 sm:$0xff]  }
   0x8   :  { %300 = vmatprep.subr.bf16.mxu0 %v2589_v9  ;;  %423 = vmatprep.subr.bf16.mxu1 %v2591_v10  ;;  %v2609_v22 = vld [vmem:[%s4020_s1 + $0x4c] ss:$16 sps:$4 sm:$0xff]   ;;  %v2611_v23 = vld [vmem:[%s4020_s1 + $0x40] ss:$16 sps:$4 sm:$0xff]   ;;  %v2612_v24 = vld [vmem:[%s4020_s1 + $0x48] ss:$16 sps:$4 sm:$0xff]  }
   0x9   :  { %v2613_v25 = vld [vmem:[%s4020_s1 + $0x24] ss:$16 sps:$4 sm:$0xff]   ;;  %v2615_v26 = vld [vmem:[%s4020_s1 + $0x2c] ss:$16 sps:$4 sm:$0xff]   ;;  %v2617_v27 = vld [vmem:[%s4020_s1 + $0x20] ss:$16 sps:$4 sm:$0xff]  }
   0xa   :  { %v2618_v28 = vld [vmem:[%s4020_s1 + $0x28] ss:$16 sps:$4 sm:$0xff]   ;;  %v2619_v29 = vld [vmem:[%s4020_s1 + $0x4] ss:$16 sps:$4 sm:$0xff]   ;;  %v2621_v30 = vld [vmem:[%s4020_s1 + $0xc] ss:$16 sps:$4 sm:$0xff]  }
   0xb   :  { %301 = vmatpush1.bf16.msra.mxu0 %v2593_v11  ;;  %424 = vmatpush1.bf16.msra.mxu1 %v2594_v12  ;;  %v2623_v31 = vld [vmem:[%s4020_s1] ss:$16 sps:$4 sm:$0xff]   ;;  %v2624_v32 = vld [vmem:[%s4020_s1 + $0x8] ss:$16 sps:$4 sm:$0xff]   ;;  %v544_v12 = vlaneseq }
   0xc   :  { %302 = vmatprep.subr.bf16.mxu0 %v2595_v13  ;;  %425 = vmatprep.subr.bf16.mxu1 %v2597_v14  ;;  %v2625_v33 = vld [vmem:[%s4021_s0] sm:$0xff]   ;;  %v2634_v34 = vld [vmem:[%s4022_s5 + $0x178] sm:$0xff]   ;;  %v2638_v38 = vld [vmem:[%s4022_s5 + $0x170] sm:$0xff]  }
   0xd   :  { %v2635_v35 = vld [vmem:[%s4022_s5 + $0x138] sm:$0xff]   ;;  %v2639_v39 = vld [vmem:[%s4022_s5 + $0x130] sm:$0xff]   ;;  %v2626_v40 = vld [vmem:[%s4021_s0 + $0x8] sm:$0xff]   ;;  %v545_v13 = vshrl.u32 %v544_v12, 7 }
   0xe   :  { %v2636_v36 = vld [vmem:[%s4022_s5 + $0x1f8] sm:$0xff]   ;;  %v2640_v41 = vld [vmem:[%s4022_s5 + $0x1f0] sm:$0xff]   ;;  %v2642_v43 = vld [vmem:[%s4022_s5 + $0x168] sm:$0xff]  }
   0xf   :  { %303 = vmatpush1.bf16.msra.mxu0 %v2599_v15  ;;  %426 = vmatpush1.bf16.msra.mxu1 %v2600_v16  ;;  %v2637_v37 = vld [vmem:[%s4022_s5 + $0x1b8] sm:$0xff]   ;;  %v2641_v42 = vld [vmem:[%s4022_s5 + $0x1b0] sm:$0xff]   ;;  %v2643_v44 = vld [vmem:[%s4022_s5 + $0x128] sm:$0xff]   ;;  %v546_v14 = vsub.s32 0, %v545_v13  ;;  %v554_v15 = vsub.s32 2, %v545_v13 }
  0x10   :  { %304 = vmatprep.subr.bf16.mxu0 %v2601_v17  ;;  %427 = vmatprep.subr.bf16.mxu1 %v2603_v18  ;;  %v2644_v45 = vld [vmem:[%s4022_s5 + $0x1e8] sm:$0xff]   ;;  %v2646_v47 = vld [vmem:[%s4022_s5 + $0x160] sm:$0xff]   ;;  %v2627_v49 = vld [vmem:[%s4021_s0 + $0x10] sm:$0xff]   ;;  %v550_v17 = vsub.s32 1, %v545_v13  ;;  %v558_v18 = vsub.s32 3, %v545_v13 }
  0x11   :  { %v2645_v46 = vld [vmem:[%s4022_s5 + $0x1a8] sm:$0xff]   ;;  %v2647_v48 = vld [vmem:[%s4022_s5 + $0x120] sm:$0xff]   ;;  %v2650_v52 = vld [vmem:[%s4022_s5 + $0x158] sm:$0xff]  }
  0x12   :  { %v2648_v50 = vld [vmem:[%s4022_s5 + $0x1e0] sm:$0xff]   ;;  %v2651_v53 = vld [vmem:[%s4022_s5 + $0x118] sm:$0xff]   ;;  %v2654_v56 = vld [vmem:[%s4022_s5 + $0x150] sm:$0xff]  }
  0x13   :  { %305 = vmatpush1.bf16.msra.mxu0 %v2605_v19  ;;  %428 = vmatpush1.bf16.msra.mxu1 %v2606_v20  ;;  %v2649_v51 = vld [vmem:[%s4022_s5 + $0x1a0] sm:$0xff]   ;;  %v2652_v54 = vld [vmem:[%s4022_s5 + $0x1d8] sm:$0xff]   ;;  %v2655_v57 = vld [vmem:[%s4022_s5 + $0x110] sm:$0xff]  }
  0x14   :  { %306 = vmatprep.subr.bf16.mxu0 %v2607_v21  ;;  %429 = vmatprep.subr.bf16.mxu1 %v2609_v22  ;;  %v2653_v55 = vld [vmem:[%s4022_s5 + $0x198] sm:$0xff]   ;;  %v2629_v59 = vld [vmem:[%s4021_s0 + $0x20] sm:$0xff]   ;;  %v2630_v60 = vld [vmem:[%s4021_s0 + $0x28] sm:$0xff]  }
  0x15   :  { %v2628_v58 = vld [vmem:[%s4021_s0 + $0x18] sm:$0xff]   ;;  %v2631_v61 = vld [vmem:[%s4021_s0 + $0x30] sm:$0xff]   ;;  %v2633_v63 = vld [vmem:[%s4021_s0 + $0x40] sm:$0xff]  }
  0x16   :  { %v2632_v62 = vld [vmem:[%s4021_s0 + $0x38] sm:$0xff]   ;;  %v2656_v0 = vld [vmem:[%s4022_s5 + $0x1d0] sm:$0xff]   ;;  %v2659_v3 = vld [vmem:[%s4022_s5 + $0x108] sm:$0xff]  }
  0x17   :  { %307 = vmatpush1.bf16.msra.mxu0 %v2611_v23  ;;  %430 = vmatpush1.bf16.msra.mxu1 %v2612_v24  ;;  %v2657_v2 = vld [vmem:[%s4022_s5 + $0x190] sm:$0xff]   ;;  %v2660_v4 = vld [vmem:[%s4022_s5 + $0x1c8] sm:$0xff]   ;;  %v2662_v6 = vld [vmem:[%s4022_s5 + $0x140] sm:$0xff]  }
  0x18   :  { %308 = vmatprep.subr.bf16.mxu0 %v2613_v25  ;;  %431 = vmatprep.subr.bf16.mxu1 %v2615_v26  ;;  %v2661_v5 = vld [vmem:[%s4022_s5 + $0x188] sm:$0xff]   ;;  %v2664_v7 = vld [vmem:[%s4022_s5 + $0x1c0] sm:$0xff]   ;;  %v2666_v10 = vld [vmem:[%s4022_s5 + $0x78] sm:$0xff]  }
  0x19   :  { %v2663_v8 = vld [vmem:[%s4022_s5 + $0x100] sm:$0xff]   ;;  %v2668_v11 = vld [vmem:[%s4022_s5 + $0xf8] sm:$0xff]  }
  0x1a   :  { %v2665_v9 = vld [vmem:[%s4022_s5 + $0x180] sm:$0xff]  }
  0x1b   :  { %309 = vmatpush1.bf16.msra.mxu0 %v2617_v27  ;;  %432 = vmatpush1.bf16.msra.mxu1 %v2618_v28  ;;  %v542_v16 = vld [vmem:[%s4023_s2] sm:$0xf] }
  0x1c   :  { %310 = vmatprep.subr.bf16.mxu0 %v2619_v29  ;;  %433 = vmatprep.subr.bf16.mxu1 %v2621_v30  ;;  %v636_v19 = vld [vmem:[%s4024_s3] sm:$0xf]  ;;  %v2998_v20 = vrot.slane %v542_v16, %v546_v14  ;;  %v3000_v21 = vrot.slane %v542_v16, %v554_v15  ;;  %v3006_v24 = vrot.slane %v542_v16, %v550_v17 }
  0x1d   :  { %v3002_v22 = vrot.slane %v636_v19, %v546_v14  ;;  %v3004_v23 = vrot.slane %v636_v19, %v554_v15  ;;  %v3008_v25 = vrot.slane %v542_v16, %v558_v18  ;;  %v3012_v30 = vrot.slane %v636_v19, %v550_v17 }
  0x1f   :  { %311 = vmatpush1.bf16.msra.mxu0 %v2623_v31  ;;  %434 = vmatpush1.bf16.msra.mxu1 %v2624_v32  ;;  %v3014_v31 = vrot.slane %v636_v19, %v558_v18 }
  0x20   :  { %2320 = vmatprep.subr.bf16.mxu0 %v2634_v34  ;;  %2384 = vmatprep.subr.bf16.mxu1 %v2636_v36 }
  0x22   :  { %329 = vmatmul.mubr.bf16.vlgmr.msra.gmra.mxu0 %v2625_v33  ;;  %452 = vmatmul.mubr.bf16.vlgmr.msra.gmra.mxu1 %v2625_v33 }
  0x23   :  { %338 = vmatprep.mubr.bf16.mxu0 %v2698_v1  ;;  %461 = vmatprep.mubr.bf16.mxu1 %v2698_v1 }
  0x24   :  { %2321 = vmatpush3.bf16.msra.mxu0 %v2635_v35  ;;  %2385 = vmatpush3.bf16.msra.mxu1 %v2637_v37 }
  0x25   :  { %2322 = vmatprep.subr.bf16.mxu0 %v2638_v38  ;;  %2386 = vmatprep.subr.bf16.mxu1 %v2640_v41  ;;  %v3023_v38 = vld [vmem:[%s4025_s4] sm:$0xff] }
  0x28   :  { %2323 = vmatpush3.bf16.msra.mxu0 %v2639_v39  ;;  %2387 = vmatpush3.bf16.msra.mxu1 %v2641_v42  ;;  %v3028_v39 = vld [vmem:[%s4025_s4 + $0x10] sm:$0xff] }
  0x29   :  { %2324 = vmatprep.subr.bf16.mxu0 %v2642_v43  ;;  %2388 = vmatprep.subr.bf16.mxu1 %v2644_v45 }
  0x2a   :  { %339 = vmatmul.mubr.bf16.gmra.mxu0 %v2626_v40  ;;  %462 = vmatmul.mubr.bf16.gmra.mxu1 %v2626_v40 }
  0x2b   :  { %348 = vmatprep.mubr.bf16.mxu0 %v2698_v1  ;;  %471 = vmatprep.mubr.bf16.mxu1 %v2698_v1 }
  0x2c   :  { %2325 = vmatpush3.bf16.msra.mxu0 %v2643_v44  ;;  %2389 = vmatpush3.bf16.msra.mxu1 %v2645_v46  ;;  %v3035_v46 = vld [vmem:[%s4025_s4 + $0x8] sm:$0xff] }
  0x2d   :  { %2326 = vmatprep.subr.bf16.mxu0 %v2646_v47  ;;  %2390 = vmatprep.subr.bf16.mxu1 %v2648_v50  ;;  %v3040_v47 = vld [vmem:[%s4025_s4 + $0x18] sm:$0xff] }
  0x30   :  { %2327 = vmatpush3.bf16.msra.mxu0 %v2647_v48  ;;  %2391 = vmatpush3.bf16.msra.mxu1 %v2649_v51 }
  0x31   :  { %2328 = vmatprep.subr.bf16.mxu0 %v2650_v52  ;;  %2392 = vmatprep.subr.bf16.mxu1 %v2652_v54 }
  0x32   :  { %349 = vmatmul.mubr.bf16.gmra.mxu0 %v2627_v49  ;;  %472 = vmatmul.mubr.bf16.gmra.mxu1 %v2627_v49 }
  0x33   :  { %358 = vmatprep.mubr.bf16.mxu0 %v2698_v1  ;;  %481 = vmatprep.mubr.bf16.mxu1 %v2698_v1 }
  0x34   :  { %2329 = vmatpush3.bf16.msra.mxu0 %v2651_v53  ;;  %2393 = vmatpush3.bf16.msra.mxu1 %v2653_v55 }
  0x35   :  { %2330 = vmatprep.subr.bf16.mxu0 %v2654_v56  ;;  %2394 = vmatprep.subr.bf16.mxu1 %v2656_v0  ;;  %v3063_v0 = vld [vmem:[%s4025_s4 + $0x20] sm:$0xff] }
  0x38   :  { %2331 = vmatpush3.bf16.msra.mxu0 %v2655_v57  ;;  %2395 = vmatpush3.bf16.msra.mxu1 %v2657_v2  ;;  %v3068_v2 = vld [vmem:[%s4025_s4 + $0x30] sm:$0xff] }
  0x39   :  { %2396 = vmatprep.subr.bf16.mxu1 %v2660_v4 }
  0x3a   :  { %359 = vmatmul.mubr.bf16.gmra.mxu0 %v2628_v58  ;;  %482 = vmatmul.mubr.bf16.gmra.mxu1 %v2628_v58 }
  0x3b   :  { %368 = vmatprep.mubr.bf16.mxu0 %v2698_v1  ;;  %491 = vmatprep.mubr.bf16.mxu1 %v2698_v1 }
  0x3c   :  { %2397 = vmatpush3.bf16.msra.mxu1 %v2661_v5 }
  0x3d   :  { %2398 = vmatprep.subr.bf16.mxu1 %v2664_v7 }
  0x40   :  { %2399 = vmatpush3.bf16.msra.mxu1 %v2665_v9 }
  0x41   :  { %2512 = vmatprep.subr.bf16.mxu1 %v2668_v11 }
  0x42   :  { %369 = vmatmul.mubr.bf16.gmra.mxu0 %v2629_v59  ;;  %492 = vmatmul.mubr.bf16.gmra.mxu1 %v2629_v59 }
  0x43   :  { %378 = vmatprep.mubr.bf16.mxu0 %v2698_v1  ;;  %501 = vmatprep.mubr.bf16.mxu1 %v2698_v1 }
  0x4a   :  { %379 = vmatmul.mubr.bf16.gmra.mxu0 %v2630_v60  ;;  %502 = vmatmul.mubr.bf16.gmra.mxu1 %v2630_v60 }
  0x4b   :  { %388 = vmatprep.mubr.bf16.mxu0 %v2698_v1  ;;  %511 = vmatprep.mubr.bf16.mxu1 %v2698_v1 }
  0x52   :  { %389 = vmatmul.mubr.bf16.gmra.mxu0 %v2631_v61  ;;  %512 = vmatmul.mubr.bf16.gmra.mxu1 %v2631_v61 }
  0x53   :  { %398 = vmatprep.mubr.bf16.mxu0 %v2698_v1  ;;  %521 = vmatprep.mubr.bf16.mxu1 %v2698_v1 }
  0x5a   :  { %399 = vmatmul.mubr.bf16.gmra.mxu0 %v2632_v62  ;;  %522 = vmatmul.mubr.bf16.gmra.mxu1 %v2632_v62 }
  0x5b   :  { %408 = vmatprep.mubr.bf16.mxu0 %v2698_v1  ;;  %531 = vmatprep.mubr.bf16.mxu1 %v2698_v1  ;;  %v2658_v1 = vld [vmem:[%s4022_s5 + $0x148] sm:$0xff]  }
  0x5c   :  { %2332 = vmatprep.subr.bf16.mxu0 %v2658_v1 }
  0x5d   :  { %2333 = vmatpush3.bf16.msra.mxu0 %v2659_v3 }
  0x5e   :  { %2334 = vmatprep.subr.bf16.mxu0 %v2662_v6 }
  0x61   :  { %2335 = vmatpush3.bf16.msra.mxu0 %v2663_v8 }
  0x62   :  { %409 = vmatmul.mubr.bf16.gmra.mxu0 %v2633_v63  ;;  %532 = vmatmul.mubr.bf16.gmra.mxu1 %v2633_v63 }
  0x63   :  { %2448 = vmatprep.subr.bf16.mxu0 %v2666_v10 }
  0xe2   :  { %v330_v26 = vpop.f32.mrf.mxu0  ;;  %v453_v27 = vpop.f32.mrf.mxu1 }
  0xe3   :  { %v564_v28 = vmul.f32 %v2998_v20, %v330_v26  ;;  %v566_v29 = vmul.f32 %v3000_v21, %v453_v27 }
  0xe4   :  { %v332_v32 = vpop.f32.mrf.mxu0  ;;  %v455_v33 = vpop.f32.mrf.mxu1 }
  0xe5   :  { %v658_v34 = vadd.f32 %v3002_v22, %v564_v28  ;;  %v660_v35 = vadd.f32 %v3004_v23, %v566_v29  ;;  %v565_v36 = vmul.f32 %v3006_v24, %v332_v32  ;;  %v567_v37 = vmul.f32 %v3008_v25, %v455_v33  ;;  %v3093_v33 = vld [vmem:[%s4025_s4 + $0x28] sm:$0xff] }
  0xe6   :  { %v334_v40 = vpop.f32.mrf.mxu0  ;;  %v457_v41 = vpop.f32.mrf.mxu1 }
  0xe7   :  { %v730_v42 = vmax.f32 %v658_v34, 0.0  ;;  %v732_v43 = vmax.f32 %v660_v35, 0.0  ;;  %v659_v44 = vadd.f32 %v3012_v30, %v565_v36  ;;  %v661_v45 = vadd.f32 %v3014_v31, %v567_v37  ;;  %v3098_v34 = vld [vmem:[%s4025_s4 + $0x40] sm:$0xff]  ;;  %v3103_v35 = vld [vmem:[%s4025_s4 + $0x50] sm:$0xff] }
  0xe8   :  { %v568_v48 = vmul.f32 %v2998_v20, %v334_v40  ;;  %v570_v49 = vmul.f32 %v3000_v21, %v457_v41  ;;  %v336_v50 = vpop.f32.mrf.mxu0  ;;  %v459_v51 = vpop.f32.mrf.mxu1 }
  0xe9   :  { %v3045_v52 = vmul.f32 %v3023_v38, %v730_v42  ;;  %v3048_v53 = vmul.f32 %v3028_v39, %v732_v43  ;;  %v731_v54 = vmax.f32 %v659_v44, 0.0  ;;  %v733_v55 = vmax.f32 %v661_v45, 0.0 }
  0xea   :  { %v662_v56 = vadd.f32 %v3002_v22, %v568_v48  ;;  %v664_v57 = vadd.f32 %v3004_v23, %v570_v49  ;;  %v569_v58 = vmul.f32 %v3006_v24, %v336_v50  ;;  %v571_v59 = vmul.f32 %v3008_v25, %v459_v51  ;;  %v340_v60 = vpop.f32.mrf.mxu0  ;;  %v463_v61 = vpop.f32.mrf.mxu1 }
  0xeb   :  { %4070 = vst [vmem:[#allocation2_spill] sm:$0xff] %v3045_v52  ;;  %4071 = vst [vmem:[#allocation3_spill] sm:$0xff] %v3048_v53  ;;  %v3055_v62 = vmul.f32 %v3035_v46, %v731_v54  ;;  %v3058_v63 = vmul.f32 %v3040_v47, %v733_v55  ;;  %v572_v1 = vmul.f32 %v2998_v20, %v340_v60 }
  0xec   :  { %v574_v3 = vmul.f32 %v3000_v21, %v463_v61  ;;  %v734_v4 = vmax.f32 %v662_v56, 0.0  ;;  %v736_v5 = vmax.f32 %v664_v57, 0.0  ;;  %v663_v6 = vadd.f32 %v3012_v30, %v569_v58  ;;  %v342_v7 = vpop.f32.mrf.mxu0  ;;  %v465_v8 = vpop.f32.mrf.mxu1  ;;  %v3121_v56 = vld [vmem:[%s4025_s4 + $0x48] sm:$0xff]  ;;  %v3126_v57 = vld [vmem:[%s4025_s4 + $0x58] sm:$0xff] }
  0xed   :  { %4072 = vst [vmem:[#allocation4_spill] sm:$0xff] %v3055_v62  ;;  %4073 = vst [vmem:[#allocation5_spill] sm:$0xff] %v3058_v63  ;;  %v666_v9 = vadd.f32 %v3002_v22, %v572_v1  ;;  %v573_v11 = vmul.f32 %v3006_v24, %v342_v7  ;;  %v575_v12 = vmul.f32 %v3008_v25, %v465_v8  ;;  %v3293_v63 = vld [vmem:[%s4025_s4 + $0xc0] sm:$0xff] }
  0xee   :  { %v668_v10 = vadd.f32 %v3004_v23, %v574_v3  ;;  %v3078_v13 = vmul.f32 %v3063_v0, %v734_v4  ;;  %v3081_v14 = vmul.f32 %v3068_v2, %v736_v5  ;;  %v735_v15 = vmax.f32 %v663_v6, 0.0  ;;  %v344_v17 = vpop.f32.mrf.mxu0  ;;  %v467_v18 = vpop.f32.mrf.mxu1  ;;  %v3135_v4 = vld [vmem:[%s4025_s4 + $0x38] sm:$0xff]  ;;  %4097 = vst [vmem:[#allocation29_spill] sm:$0xff] %v3293_v63 }
  0xef   :  { %v665_v16 = vadd.f32 %v3014_v31, %v571_v59  ;;  %v738_v19 = vmax.f32 %v666_v9, 0.0  ;;  %v667_v27 = vadd.f32 %v3012_v30, %v573_v11  ;;  %v669_v28 = vadd.f32 %v3014_v31, %v575_v12  ;;  %v3150_v12 = vld [vmem:[%s4025_s4 + $0x60] sm:$0xff] }
  0xf0   :  { %4074 = vst [vmem:[#allocation6_spill] sm:$0xff] %v3078_v13  ;;  %4075 = vst [vmem:[#allocation7_spill] sm:$0xff] %v3081_v14  ;;  %v740_v26 = vmax.f32 %v668_v10, 0.0  ;;  %v346_v36 = vpop.f32.mrf.mxu0  ;;  %v469_v37 = vpop.f32.mrf.mxu1  ;;  %v576_v42 = vmul.f32 %v2998_v20, %v344_v17  ;;  %v578_v43 = vmul.f32 %v3000_v21, %v467_v18  ;;  %v3110_v50 = vmul.f32 %v3093_v33, %v735_v15 }
  0xf1   :  { %v739_v40 = vmax.f32 %v667_v27, 0.0  ;;  %v741_v41 = vmax.f32 %v669_v28, 0.0  ;;  %v577_v44 = vmul.f32 %v3006_v24, %v346_v36  ;;  %v579_v45 = vmul.f32 %v3008_v25, %v469_v37 }
  0xf2   :  { %v350_v48 = vpop.f32.mrf.mxu0  ;;  %v473_v49 = vpop.f32.mrf.mxu1  ;;  %4076 = vst [vmem:[#allocation8_spill] sm:$0xff] %v3110_v50  ;;  %v737_v51 = vmax.f32 %v665_v16, 0.0  ;;  %v3113_v54 = vmul.f32 %v3098_v34, %v738_v19  ;;  %v3116_v55 = vmul.f32 %v3103_v35, %v740_v26  ;;  %v670_v58 = vadd.f32 %v3002_v22, %v576_v42  ;;  %v3155_v16 = vld [vmem:[%s4025_s4 + $0x70] sm:$0xff]  ;;  %v3176_v42 = vld [vmem:[%s4025_s4 + $0x78] sm:$0xff] }
  0xf3   :  { %v672_v59 = vadd.f32 %v3004_v23, %v578_v43  ;;  %v671_v60 = vadd.f32 %v3012_v30, %v577_v44  ;;  %v673_v61 = vadd.f32 %v3014_v31, %v579_v45  ;;  %v580_v5 = vmul.f32 %v2998_v20, %v350_v48  ;;  %v3181_v43 = vld [vmem:[%s4025_s4 + $0x80] sm:$0xff] }
  0xf4   :  { %4077 = vst [vmem:[#allocation9_spill] sm:$0xff] %v3113_v54  ;;  %4078 = vst [vmem:[#allocation10_spill] sm:$0xff] %v3116_v55  ;;  %v352_v1 = vpop.f32.mrf.mxu0  ;;  %v475_v3 = vpop.f32.mrf.mxu1  ;;  %v582_v6 = vmul.f32 %v3000_v21, %v473_v49  ;;  %v3142_v9 = vmul.f32 %v3121_v56, %v739_v40  ;;  %v3145_v10 = vmul.f32 %v3126_v57, %v741_v41  ;;  %v742_v11 = vmax.f32 %v670_v58, 0.0  ;;  %v3171_v41 = vld [vmem:[%s4025_s4 + $0x68] sm:$0xff] }
  0xf5   :  { %v581_v7 = vmul.f32 %v3006_v24, %v352_v1  ;;  %v583_v8 = vmul.f32 %v3008_v25, %v475_v3  ;;  %v744_v15 = vmax.f32 %v672_v59, 0.0  ;;  %v743_v19 = vmax.f32 %v671_v60, 0.0  ;;  %4082 = vst [vmem:[#allocation14_spill] sm:$0xff] %v3181_v43 }
  0xf6   :  { %4079 = vst [vmem:[#allocation11_spill] sm:$0xff] %v3142_v9  ;;  %4080 = vst [vmem:[#allocation12_spill] sm:$0xff] %v3145_v10  ;;  %v354_v17 = vpop.f32.mrf.mxu0  ;;  %v477_v18 = vpop.f32.mrf.mxu1  ;;  %v745_v26 = vmax.f32 %v673_v61, 0.0  ;;  %v674_v27 = vadd.f32 %v3002_v22, %v580_v5  ;;  %v3159_v28 = vadd.f32 %v3004_v23, %v582_v6  ;;  %v3162_v36 = vmul.f32 %v3135_v4, %v737_v51 }
  0xf7   :  { %v942_v37 = vpack.c.bf16 %v3113_v54, %v3078_v13  ;;  %v944_v40 = vpack.c.bf16 %v3116_v55, %v3081_v14  ;;  %v675_v44 = vadd.f32 %v3012_v30, %v581_v7  ;;  %v3185_v49 = vmul.f32 %v3150_v12, %v742_v11  ;;  %v2667_v7 = vld [vmem:[%s4022_s5 + $0x38] sm:$0xff]  }
  0xf8   :  { %4081 = vst [vmem:[#allocation13_spill] sm:$0xff] %v3162_v36  ;;  %v356_v45 = vpop.f32.mrf.mxu0  ;;  %v479_v48 = vpop.f32.mrf.mxu1  ;;  %v3188_v51 = vmul.f32 %v3155_v16, %v744_v15  ;;  %v746_v58 = vmax.f32 %v674_v27, 0.0  ;;  %v677_v59 = vadd.f32 %v3014_v31, %v583_v8  ;;  %v584_v60 = vmul.f32 %v2998_v20, %v354_v17  ;;  %v2669_v8 = vld [vmem:[%s4022_s5 + $0xb8] sm:$0xff]   ;;  %v2670_v27 = vld [vmem:[%s4022_s5 + $0x70] sm:$0xff]  }
  0xf9   :  { %4083 = vst [vmem:[#allocation15_spill] sm:$0xff] %v3185_v49  ;;  %v586_v61 = vmul.f32 %v3000_v21, %v477_v18  ;;  %v943_v1 = vpack.c.bf16 %v3142_v9, %v3110_v50  ;;  %v945_v3 = vpack.c.bf16 %v3145_v10, %v3162_v36  ;;  %v3204_v11 = vmul.f32 %v3171_v41, %v743_v19  ;;  %v3288_v36 = vld [vmem:[%s4025_s4 + $0xb8] sm:$0xff] }
  0xfa   :  { %4084 = vst [vmem:[#allocation16_spill] sm:$0xff] %v3188_v51  ;;  %v360_v5 = vpop.f32.mrf.mxu0  ;;  %v483_v6 = vpop.f32.mrf.mxu1  ;;  %v3207_v15 = vmul.f32 %v3176_v42, %v745_v26  ;;  %v3210_v17 = vmul.f32 %v3181_v43, %v746_v58  ;;  %v748_v18 = vmax.f32 %v3159_v28, 0.0  ;;  %v747_v32 = vmax.f32 %v675_v44, 0.0  ;;  %v2672_v58 = vld [vmem:[%s4022_s5 + $0xf0] sm:$0xff]   ;;  %v3230_v44 = vld [vmem:[%s4025_s4 + $0x88] sm:$0xff]  ;;  %4096 = vst [vmem:[#allocation28_spill] sm:$0xff] %v3288_v36 }
  0xfb   :  { %4085 = vst [vmem:[#allocation17_spill] sm:$0xff] %v3204_v11  ;;  %v678_v29 = vadd.f32 %v3002_v22, %v584_v60  ;;  %v680_v55 = vadd.f32 %v3004_v23, %v586_v61  ;;  %1327 = vmatprep.mubr.bf16.mxu0 %v943_v1  ;;  %1424 = vmatprep.mubr.bf16.mxu1 %v945_v3  ;;  %v3225_v28 = vld [vmem:[%s4025_s4 + $0x90] sm:$0xff]  ;;  %v749_v60 = vmax.f32 %v677_v59, 0.0  ;;  %v3238_v3 = vld [vmem:[%s4025_s4 + $0x98] sm:$0xff] }
  0xfc   :  { %4086 = vst [vmem:[#allocation18_spill] sm:$0xff] %v3207_v15  ;;  %4087 = vst [vmem:[#allocation19_spill] sm:$0xff] %v3210_v17  ;;  %v585_v19 = vmul.f32 %v3006_v24, %v356_v45  ;;  %v362_v26 = vpop.f32.mrf.mxu0  ;;  %v485_v54 = vpop.f32.mrf.mxu1  ;;  %v587_v61 = vmul.f32 %v3008_v25, %v479_v48  ;;  %1328 = vmatmul.mubr.bf16.vlgmr.msra.gmra.mxu0 %v942_v37  ;;  %1425 = vmatmul.mubr.bf16.vlgmr.msra.gmra.mxu1 %v944_v40  ;;  %v2671_v37 = vld [vmem:[%s4022_s5 + $0x30] sm:$0xff]  }
  0xfd   :  { %4088 = vst [vmem:[#allocation20_spill] sm:$0xff] %v3225_v28  ;;  %v588_v45 = vmul.f32 %v2998_v20, %v360_v5  ;;  %v590_v1 = vmul.f32 %v3000_v21, %v483_v6  ;;  %4089 = vst [vmem:[#allocation21_spill] sm:$0xff] %v3238_v3  ;;  %v750_v53 = vmax.f32 %v678_v29, 0.0  ;;  %v752_v14 = vmax.f32 %v680_v55, 0.0  ;;  %2449 = vmatpush3.bf16.msra.mxu0 %v2667_v7  ;;  %v2673_v40 = vld [vmem:[%s4022_s5 + $0xb0] sm:$0xff]   ;;  %v3251_v29 = vld [vmem:[%s4025_s4 + $0xa0] sm:$0xff] }
  0xfe   :  { %v679_v52 = vadd.f32 %v3012_v30, %v585_v19  ;;  %v589_v13 = vmul.f32 %v3006_v24, %v362_v26  ;;  %v364_v59 = vpop.f32.mrf.mxu0  ;;  %v487_v48 = vpop.f32.mrf.mxu1  ;;  %2513 = vmatpush3.bf16.msra.mxu1 %v2669_v8  ;;  %4090 = vst [vmem:[#allocation22_spill] sm:$0xff] %v3251_v29  ;;  %v681_v55 = vadd.f32 %v3014_v31, %v587_v61  ;;  %v2674_v8 = vld [vmem:[%s4022_s5 + $0x68] sm:$0xff]  }
  0xff   :  { %v682_v5 = vadd.f32 %v3002_v22, %v588_v45  ;;  %v3256_v6 = vadd.f32 %v3004_v23, %v590_v1  ;;  %v591_v7 = vmul.f32 %v3008_v25, %v485_v54  ;;  %2450 = vmatprep.subr.bf16.mxu0 %v2670_v27  ;;  %v2676_v19 = vld [vmem:[%s4022_s5 + $0xe8] sm:$0xff]   ;;  %v3266_v26 = vmul.f32 %v3225_v28, %v748_v18  ;;  %v3274_v45 = vld [vmem:[%s4025_s4 + $0xb0] sm:$0xff] }
 0x100   :  { %v3269_v61 = vmul.f32 %v3230_v44, %v747_v32  ;;  %4093 = vst [vmem:[#allocation25_spill] sm:$0xff] %v3274_v45  ;;  %v751_v54 = vmax.f32 %v679_v52, 0.0  ;;  %v3279_v27 = vld [vmem:[%s4025_s4 + $0xa8] sm:$0xff]  ;;  %v683_v1 = vadd.f32 %v3012_v30, %v589_v13  ;;  %v366_v10 = vpop.f32.mrf.mxu0  ;;  %v489_v9 = vpop.f32.mrf.mxu1  ;;  %2514 = vmatprep.subr.bf16.mxu1 %v2672_v58  ;;  %v3283_v18 = vmul.f32 %v3238_v3, %v749_v60 }
 0x101   :  { %4091 = vst [vmem:[#allocation23_spill] sm:$0xff] %v3266_v26  ;;  %4094 = vst [vmem:[#allocation26_spill] sm:$0xff] %v3279_v27  ;;  %v753_v32 = vmax.f32 %v681_v55, 0.0  ;;  %v754_v52 = vmax.f32 %v682_v5, 0.0  ;;  %v685_v13 = vadd.f32 %v3014_v31, %v591_v7  ;;  %v3297_v50 = vmul.f32 %v3251_v29, %v750_v53  ;;  %2451 = vmatpush3.bf16.msra.mxu0 %v2671_v37  ;;  %v2675_v5 = vld [vmem:[%s4022_s5 + $0x28] sm:$0xff]   ;;  %v3320_v37 = vld [vmem:[%s4025_s4 + $0xd0] sm:$0xff] }
 0x102   :  { %4092 = vst [vmem:[#allocation24_spill] sm:$0xff] %v3269_v61  ;;  %4095 = vst [vmem:[#allocation27_spill] sm:$0xff] %v3283_v18  ;;  %v592_v58 = vmul.f32 %v2998_v20, %v364_v59  ;;  %v594_v60 = vmul.f32 %v3000_v21, %v487_v48  ;;  %v370_v55 = vpop.f32.mrf.mxu0  ;;  %v493_v62 = vpop.f32.mrf.mxu1  ;;  %2515 = vmatpush3.bf16.msra.mxu1 %v2673_v40  ;;  %v3305_v28 = vmul.f32 %v3274_v45, %v752_v14 }
 0x103   :  { %4098 = vst [vmem:[#allocation30_spill] sm:$0xff] %v3297_v50  ;;  %v3308_v7 = vmul.f32 %v3279_v27, %v751_v54  ;;  %v756_v53 = vmax.f32 %v3256_v6, 0.0  ;;  %v755_v29 = vmax.f32 %v683_v1, 0.0  ;;  %2452 = vmatprep.subr.bf16.mxu0 %v2674_v8  ;;  %2516 = vmatprep.subr.bf16.mxu1 %v2676_v19  ;;  %v3312_v59 = vmul.f32 %v3288_v36, %v753_v32  ;;  %v3327_v8 = vld [vmem:[%s4025_s4 + $0xc8] sm:$0xff] }
 0x104   :  { %4099 = vst [vmem:[#allocation31_spill] sm:$0xff] %v3305_v28  ;;  %v3315_v48 = vmul.f32 %v3293_v63, %v754_v52  ;;  %4102 = vst [vmem:[#allocation34_spill] sm:$0xff] %v3320_v37  ;;  %v757_v14 = vmax.f32 %v685_v13, 0.0  ;;  %v947_v40 = vpack.c.bf16 %v3269_v61, %v3204_v11  ;;  %v372_v54 = vpop.f32.mrf.mxu0  ;;  %v495_v6 = vpop.f32.mrf.mxu1  ;;  %v3330_v19 = vadd.f32 %v3002_v22, %v592_v58  ;;  %v2677_v13 = vld [vmem:[%s4022_s5 + $0xa8] sm:$0xff]   ;;  %v2678_v61 = vld [vmem:[%s4022_s5 + $0x60] sm:$0xff]  }
 0x105   :  { %4100 = vst [vmem:[#allocation32_spill] sm:$0xff] %v3308_v7  ;;  %4103 = vst [vmem:[#allocation35_spill] sm:$0xff] %v3327_v8  ;;  %v949_v1 = vpack.c.bf16 %v3283_v18, %v3207_v15  ;;  %v593_v32 = vmul.f32 %v3006_v24, %v366_v10  ;;  %v595_v52 = vmul.f32 %v3008_v25, %v489_v9  ;;  %v3345_v58 = vld [vmem:[%s4025_s4 + $0xd8] sm:$0xff]  ;;  %2453 = vmatpush3.bf16.msra.mxu0 %v2675_v5  ;;  %v2679_v63 = vld [vmem:[%s4022_s5 + $0x20] sm:$0xff]  }
 0x106   :  { %4101 = vst [vmem:[#allocation33_spill] sm:$0xff] %v3315_v48  ;;  %4104 = vst [vmem:[#allocation36_spill] sm:$0xff] %v3345_v58  ;;  %v3348_v11 = vadd.f32 %v3004_v23, %v594_v60  ;;  %1335 = vmatprep.mubr.bf16.mxu0 %v947_v40  ;;  %v946_v9 = vpack.c.bf16 %v3210_v17, %v3185_v49  ;;  %v948_v10 = vpack.c.bf16 %v3266_v26, %v3188_v51  ;;  %v374_v18 = vpop.f32.mrf.mxu0  ;;  %v497_v15 = vpop.f32.mrf.mxu1  ;;  %v2680_v51 = vld [vmem:[%s4022_s5 + $0xe0] sm:$0xff]   ;;  %v2682_v5 = vld [vmem:[%s4022_s5 + $0x58] sm:$0xff]  }
 0x107   :  { %1432 = vmatprep.mubr.bf16.mxu1 %v949_v1  ;;  %v687_v36 = vadd.f32 %v3012_v30, %v593_v32  ;;  %v689_v60 = vadd.f32 %v3014_v31, %v595_v52  ;;  %v596_v40 = vmul.f32 %v2998_v20, %v370_v55  ;;  %v598_v27 = vmul.f32 %v3000_v21, %v493_v62  ;;  %v3376_v55 = vld [vmem:[%s4025_s4 + $0xe8] sm:$0xff] }
 0x108   :  { %v3368_v49 = vmul.f32 %v3320_v37, %v756_v53  ;;  %v3371_v1 = vmul.f32 %v3327_v8, %v755_v29  ;;  %4107 = vst [vmem:[#allocation39_spill] sm:$0xff] %v3376_v55  ;;  %1336 = vmatmul.mubr.bf16.gmra.mxu0 %v946_v9  ;;  %1433 = vmatmul.mubr.bf16.gmra.mxu1 %v948_v10  ;;  %v376_v32 = vpop.f32.mrf.mxu0  ;;  %v499_v52 = vpop.f32.mrf.mxu1  ;;  %v2681_v29 = vld [vmem:[%s4022_s5 + $0xa0] sm:$0xff]  }
 0x109   :  { %v597_v62 = vmul.f32 %v3006_v24, %v372_v54  ;;  %v3380_v26 = vmul.f32 %v3345_v58, %v757_v14  ;;  %v759_v17 = vmax.f32 %v687_v36, 0.0  ;;  %v761_v53 = vmax.f32 %v689_v60, 0.0  ;;  %2517 = vmatpush3.bf16.msra.mxu1 %v2677_v13  ;;  %2454 = vmatprep.subr.bf16.mxu0 %v2678_v61  ;;  %v3391_v54 = vld [vmem:[%s4025_s4 + $0xf8] sm:$0xff] }
 0x10a   :  { %4105 = vst [vmem:[#allocation37_spill] sm:$0xff] %v3368_v49  ;;  %4106 = vst [vmem:[#allocation38_spill] sm:$0xff] %v3371_v1  ;;  %v3383_v37 = vadd.f32 %v3002_v22, %v596_v40  ;;  %v599_v14 = vmul.f32 %v3008_v25, %v495_v6  ;;  %v600_v36 = vmul.f32 %v2998_v20, %v374_v18  ;;  %v380_v60 = vpop.f32.mrf.mxu0  ;;  %v503_v13 = vpop.f32.mrf.mxu1  ;;  %2455 = vmatpush3.bf16.msra.mxu0 %v2679_v63  ;;  %v2683_v61 = vld [vmem:[%s4022_s5 + $0x18] sm:$0xff]   ;;  %v3414_v63 = vld [vmem:[%s4025_s4 + $0x108] sm:$0xff] }
 0x10b   :  { %4108 = vst [vmem:[#allocation40_spill] sm:$0xff] %v3380_v26  ;;  %4109 = vst [vmem:[#allocation41_spill] sm:$0xff] %v3391_v54  ;;  %v691_v9 = vadd.f32 %v3012_v30, %v597_v62  ;;  %v602_v10 = vmul.f32 %v3000_v21, %v497_v15  ;;  %v2684_v40 = vld [vmem:[%s4022_s5 + $0xd8] sm:$0xff]   ;;  %v3406_v6 = vmul.f32 %v3376_v55, %v759_v17  ;;  %2518 = vmatprep.subr.bf16.mxu1 %v2680_v51 }
 0x10c   :  { %v3409_v15 = vadd.f32 %v3004_v23, %v598_v27  ;;  %2456 = vmatprep.subr.bf16.mxu0 %v2682_v5  ;;  %v693_v8 = vadd.f32 %v3014_v31, %v599_v14  ;;  %v694_v58 = vadd.f32 %v3002_v22, %v600_v36  ;;  %v382_v45 = vpop.f32.mrf.mxu0  ;;  %v505_v17 = vpop.f32.mrf.mxu1  ;;  %v2686_v27 = vld [vmem:[%s4022_s5 + $0x50] sm:$0xff]   ;;  %v3423_v55 = vmul.f32 %v3391_v54, %v761_v53  ;;  %v3429_v51 = vld [vmem:[%s4025_s4 + $0x118] sm:$0xff] }
 0x10d   :  { %v763_v18 = vmax.f32 %v691_v9, 0.0  ;;  %v696_v62 = vadd.f32 %v3004_v23, %v602_v10  ;;  %v762_v43 = vmax.f32 %v3383_v37, 0.0  ;;  %v951_v5 = vpack.c.bf16 %v3371_v1, %v3308_v7  ;;  %2519 = vmatpush3.bf16.msra.mxu1 %v2681_v29 }
 0x10e   :  { %v953_v9 = vpack.c.bf16 %v3380_v26, %v3312_v59  ;;  %v765_v36 = vmax.f32 %v693_v8, 0.0  ;;  %v766_v53 = vmax.f32 %v694_v58, 0.0  ;;  %v384_v54 = vpop.f32.mrf.mxu0  ;;  %v507_v37 = vpop.f32.mrf.mxu1  ;;  %2457 = vmatpush3.bf16.msra.mxu0 %v2683_v61  ;;  %2520 = vmatprep.subr.bf16.mxu1 %v2684_v40  ;;  %v764_v3 = vmax.f32 %v3409_v15, 0.0  ;;  %v2685_v8 = vld [vmem:[%s4022_s5 + $0x98] sm:$0xff]   ;;  %v2687_v58 = vld [vmem:[%s4022_s5 + $0x10] sm:$0xff]  }
 0x10f   :  { %v3436_v14 = vmul.f32 %v3414_v63, %v763_v18  ;;  %v768_v10 = vmax.f32 %v696_v62, 0.0  ;;  %1343 = vmatprep.mubr.bf16.mxu0 %v951_v5  ;;  %v601_v1 = vmul.f32 %v3006_v24, %v376_v32  ;;  %v603_v7 = vmul.f32 %v3008_v25, %v499_v52  ;;  %2458 = vmatprep.subr.bf16.mxu0 %v2686_v27  ;;  %v2688_v18 = vld [vmem:[%s4022_s5 + $0xd0] sm:$0xff]   ;;  %v3466_v5 = vld [vmem:[%s4025_s4 + $0x100] sm:$0xff]  ;;  %v2690_v27 = vld [vmem:[%s4022_s5 + $0x48] sm:$0xff]  }
 0x110   :  { %1440 = vmatprep.mubr.bf16.mxu1 %v953_v9  ;;  %v950_v29 = vpack.c.bf16 %v3315_v48, %v3297_v50  ;;  %v3450_v61 = vmul.f32 %v3429_v51, %v765_v36  ;;  %v3453_v40 = vmul.f32 %v3023_v38, %v766_v53  ;;  %v952_v52 = vpack.c.bf16 %v3368_v49, %v3305_v28  ;;  %v386_v62 = vpop.f32.mrf.mxu0  ;;  %v509_v15 = vpop.f32.mrf.mxu1 }
 0x111   :  { %v3456_v32 = vmul.f32 %v3028_v39, %v768_v10  ;;  %v695_v38 = vadd.f32 %v3012_v30, %v601_v1  ;;  %v697_v39 = vadd.f32 %v3014_v31, %v603_v7  ;;  %v604_v9 = vmul.f32 %v2998_v20, %v380_v60  ;;  %v3482_v60 = vld [vmem:[%s4025_s4 + $0xe0] sm:$0xff]  ;;  %2521 = vmatpush3.bf16.msra.mxu1 %v2685_v8 }
 0x112   :  { %4110 = vst [vmem:[#allocation42_spill] sm:$0xff] %v3453_v40  ;;  %1344 = vmatmul.mubr.bf16.gmra.mxu0 %v950_v29  ;;  %v606_v36 = vmul.f32 %v3000_v21, %v503_v13  ;;  %1441 = vmatmul.mubr.bf16.gmra.mxu1 %v952_v52  ;;  %v605_v53 = vmul.f32 %v3006_v24, %v382_v45  ;;  %v390_v40 = vpop.f32.mrf.mxu0  ;;  %v513_v7 = vpop.f32.mrf.mxu1  ;;  %v3487_v13 = vld [vmem:[%s4025_s4 + $0x110] sm:$0xff] }
 0x113   :  { %4111 = vst [vmem:[#allocation43_spill] sm:$0xff] %v3456_v32  ;;  %v607_v10 = vmul.f32 %v3008_v25, %v505_v17  ;;  %v608_v32 = vmul.f32 %v2998_v20, %v384_v54  ;;  %v610_v1 = vmul.f32 %v3000_v21, %v507_v37  ;;  %4112 = vst [vmem:[#allocation44_spill] sm:$0xff] %v3487_v13  ;;  %v767_v29 = vmax.f32 %v695_v38, 0.0  ;;  %v2689_v37 = vld [vmem:[%s4022_s5 + $0x90] sm:$0xff]  }
 0x114   :  { %v769_v45 = vmax.f32 %v697_v39, 0.0  ;;  %v698_v17 = vadd.f32 %v3002_v22, %v604_v9  ;;  %v3491_v54 = vadd.f32 %v3004_v23, %v606_v36  ;;  %2459 = vmatpush3.bf16.msra.mxu0 %v2687_v58  ;;  %v3499_v52 = vld [vmem:[%s4025_s4 + $0xf0] sm:$0xff]  ;;  %v870_v49 = vmul.f32 %v3466_v5, %v762_v43  ;;  %v392_v58 = vpop.f32.mrf.mxu0  ;;  %v515_v9 = vpop.f32.mrf.mxu1  ;;  %2522 = vmatprep.subr.bf16.mxu1 %v2688_v18  ;;  %v2691_v36 = vld [vmem:[%s4022_s5 + $0x8] sm:$0xff]  }
 0x115   :  { %v3503_v38 = vadd.f32 %v3012_v30, %v605_v53  ;;  %v3506_v39 = vadd.f32 %v3014_v31, %v607_v10  ;;  %v3509_v8 = vadd.f32 %v3002_v22, %v608_v32  ;;  %v3515_v48 = vmul.f32 %v3035_v46, %v767_v29  ;;  %2460 = vmatprep.subr.bf16.mxu0 %v2690_v27  ;;  %v2692_v46 = vld [vmem:[%s4022_s5 + $0xc8] sm:$0xff]  }
 0x116   :  { %v3518_v43 = vmul.f32 %v3040_v47, %v769_v45  ;;  %v770_v53 = vmax.f32 %v698_v17, 0.0  ;;  %v3521_v10 = vadd.f32 %v3004_v23, %v610_v1  ;;  %v4115_v32 = vmax.f32 %v3330_v19, 0.0  ;;  %v394_v28 = vpop.f32.mrf.mxu0  ;;  %v517_v50 = vpop.f32.mrf.mxu1  ;;  %2523 = vmatpush3.bf16.msra.mxu1 %v2689_v37  ;;  %v2693_v37 = vld [vmem:[%s4022_s5 + $0x88] sm:$0xff]  }
 0x117   :  { %4113 = vst [vmem:[#allocation45_spill] sm:$0xff] %v3515_v48  ;;  %v872_v18 = vmul.f32 %v3487_v13, %v764_v3  ;;  %v4116_v47 = vmax.f32 %v3348_v11, 0.0  ;;  %v772_v27 = vmax.f32 %v3491_v54, 0.0  ;;  %v955_v19 = vpack.c.bf16 %v3436_v14, %v3406_v6  ;;  %2524 = vmatprep.subr.bf16.mxu1 %v2692_v46 }
 0x118   :  { %4114 = vst [vmem:[#allocation46_spill] sm:$0xff] %v3518_v43  ;;  %v3526_v26 = vmul.f32 %v3482_v60, %v4115_v32  ;;  %v957_v1 = vpack.c.bf16 %v3450_v61, %v3423_v55  ;;  %v3543_v3 = vmul.f32 %v3063_v0, %v770_v53  ;;  %v771_v45 = vmax.f32 %v3503_v38, 0.0  ;;  %v396_v32 = vpop.f32.mrf.mxu0  ;;  %2461 = vmatpush3.bf16.msra.mxu0 %v2691_v36  ;;  %v2694_v38 = vld [vmem:[%s4022_s5 + $0x40] sm:$0xff]  }
 0x119   :  { %v3535_v29 = vmul.f32 %v3499_v52, %v4116_v47  ;;  %v773_v17 = vmax.f32 %v3506_v39, 0.0  ;;  %v774_v11 = vmax.f32 %v3509_v8, 0.0  ;;  %v519_v47 = vpop.f32.mrf.mxu1  ;;  %v776_v54 = vmax.f32 %v3521_v10, 0.0  ;;  %1351 = vmatprep.mubr.bf16.mxu0 %v955_v19  ;;  %v2696_v10 = vld [vmem:[%s4022_s5 + $0xc0] sm:$0xff]   ;;  %2462 = vmatprep.subr.bf16.mxu0 %v2694_v38 }
 0x11a   :  { %1448 = vmatprep.mubr.bf16.mxu1 %v957_v1  ;;  %v609_v14 = vmul.f32 %v3006_v24, %v386_v62  ;;  %v611_v61 = vmul.f32 %v3008_v25, %v509_v15  ;;  %v954_v0 = vpack.c.bf16 %v870_v49, %v3526_v26  ;;  %v612_v8 = vmul.f32 %v2998_v20, %v390_v40  ;;  %v400_v53 = vpop.f32.mrf.mxu0  ;;  %v2695_v49 = vld [vmem:[%s4022_s5] sm:$0xff]  }
 0x11b   :  { %4117 = vst [vmem:[#allocation47_spill] sm:$0xff] %v3535_v29  ;;  %v956_v39 = vpack.c.bf16 %v872_v18, %v3535_v29  ;;  %v614_v36 = vmul.f32 %v3000_v21, %v513_v7  ;;  %v613_v62 = vmul.f32 %v3006_v24, %v392_v58  ;;  %v523_v15 = vpop.f32.mrf.mxu1  ;;  %v615_v40 = vmul.f32 %v3008_v25, %v515_v9 }
 0x11c   :  { %v703_v19 = vadd.f32 %v3012_v30, %v609_v14  ;;  %v705_v18 = vadd.f32 %v3014_v31, %v611_v61  ;;  %1352 = vmatmul.mubr.bf16.gmra.mxu0 %v954_v0  ;;  %v616_v7 = vmul.f32 %v2998_v20, %v394_v28  ;;  %v706_v58 = vadd.f32 %v3002_v22, %v612_v8  ;;  %v402_v48 = vpop.f32.mrf.mxu0  ;;  %v2697_v28 = vld [vmem:[%s4022_s5 + $0x80] sm:$0xff]  }
 0x11d   :  { %1449 = vmatmul.mubr.bf16.gmra.mxu1 %v956_v39  ;;  %v708_v46 = vadd.f32 %v3004_v23, %v614_v36  ;;  %v707_v1 = vadd.f32 %v3012_v30, %v613_v62  ;;  %v618_v43 = vmul.f32 %v3000_v21, %v517_v50  ;;  %v525_v29 = vpop.f32.mrf.mxu1  ;;  %v709_v61 = vadd.f32 %v3014_v31, %v615_v40 }
 0x11e   :  { %v775_v13 = vmax.f32 %v703_v19, 0.0  ;;  %v777_v14 = vmax.f32 %v705_v18, 0.0  ;;  %v3578_v0 = vadd.f32 %v3002_v22, %v616_v7  ;;  %2525 = vmatpush3.bf16.msra.mxu1 %v2693_v37  ;;  %v3584_v9 = vmul.f32 %v3068_v2, %v772_v27  ;;  %v404_v36 = vpop.f32.mrf.mxu0  ;;  %2463 = vmatpush3.bf16.msra.mxu0 %v2695_v49 }
 0x11f   :  { %v3587_v50 = vmul.f32 %v3093_v33, %v771_v45  ;;  %v778_v39 = vmax.f32 %v706_v58, 0.0  ;;  %v780_v8 = vmax.f32 %v708_v46, 0.0  ;;  %v527_v62 = vpop.f32.mrf.mxu1  ;;  %2526 = vmatprep.subr.bf16.mxu1 %v2696_v10  ;;  %v3590_v19 = vmul.f32 %v3135_v4, %v773_v17 }
 0x120   :  { %v3593_v37 = vmul.f32 %v3098_v34, %v774_v11  ;;  %v3596_v38 = vmul.f32 %v3121_v56, %v775_v13  ;;  %v3599_v2 = vmul.f32 %v3126_v57, %v777_v14  ;;  %v3602_v33 = vmul.f32 %v3103_v35, %v776_v54  ;;  %v406_v10 = vpop.f32.mrf.mxu0 }
 0x121   :  { %v779_v27 = vmax.f32 %v707_v1, 0.0  ;;  %v781_v45 = vmax.f32 %v709_v61, 0.0  ;;  %v712_v49 = vadd.f32 %v3004_v23, %v618_v43  ;;  %v529_v18 = vpop.f32.mrf.mxu1  ;;  %v3606_v4 = vmul.f32 %v3150_v12, %v778_v39 }
 0x122   :  { %v782_v34 = vmax.f32 %v3578_v0, 0.0  ;;  %v617_v56 = vmul.f32 %v3006_v24, %v396_v32  ;;  %v619_v13 = vmul.f32 %v3008_v25, %v519_v47  ;;  %2527 = vmatpush3.bf16.msra.mxu1 %v2697_v28  ;;  %v3612_v57 = vmul.f32 %v3155_v16, %v780_v8  ;;  %v410_v11 = vpop.f32.mrf.mxu0 }
 0x123   :  { %v620_v35 = vmul.f32 %v2998_v20, %v400_v53  ;;  %v622_v17 = vmul.f32 %v3000_v21, %v523_v15  ;;  %v959_v43 = vpack.c.bf16 %v3596_v38, %v3587_v50  ;;  %v533_v12 = vpop.f32.mrf.mxu1  ;;  %v961_v32 = vpack.c.bf16 %v3599_v2, %v3590_v19 }
 0x124   :  { %v711_v54 = vadd.f32 %v3012_v30, %v617_v56  ;;  %v713_v40 = vadd.f32 %v3014_v31, %v619_v13  ;;  %v621_v47 = vmul.f32 %v3006_v24, %v402_v48  ;;  %v623_v15 = vmul.f32 %v3008_v25, %v525_v29  ;;  %v412_v39 = vpop.f32.mrf.mxu0 }
 0x125   :  { %v714_v16 = vadd.f32 %v3002_v22, %v620_v35  ;;  %v716_v53 = vadd.f32 %v3004_v23, %v622_v17  ;;  %1359 = vmatprep.mubr.bf16.mxu0 %v959_v43  ;;  %v958_v7 = vpack.c.bf16 %v3593_v37, %v3543_v3  ;;  %1456 = vmatprep.mubr.bf16.mxu1 %v961_v32  ;;  %v784_v61 = vmax.f32 %v712_v49, 0.0  ;;  %v535_v29 = vpop.f32.mrf.mxu1  ;;  %v4118_v17 = vld [vmem:[#allocation21_spill] sm:$0xff] }
 0x126   :  { %v783_v58 = vmax.f32 %v711_v54, 0.0  ;;  %v785_v46 = vmax.f32 %v713_v40, 0.0  ;;  %v715_v1 = vadd.f32 %v3012_v30, %v621_v47  ;;  %v960_v14 = vpack.c.bf16 %v3602_v33, %v3584_v9  ;;  %v4119_v40 = vld [vmem:[#allocation14_spill] sm:$0xff]  ;;  %v4120_v47 = vld [vmem:[#allocation20_spill] sm:$0xff] }
 0x127   :  { %v786_v48 = vmax.f32 %v714_v16, 0.0  ;;  %v717_v0 = vadd.f32 %v3014_v31, %v623_v15  ;;  %1360 = vmatmul.mubr.bf16.gmra.mxu0 %v958_v7  ;;  %v624_v28 = vmul.f32 %v2998_v20, %v404_v36  ;;  %v3634_v8 = vmul.f32 %v3171_v41, %v779_v27  ;;  %v414_v15 = vpop.f32.mrf.mxu0  ;;  %v537_v7 = vpop.f32.mrf.mxu1 }
 0x128   :  { %v3637_v56 = vmul.f32 %v3230_v44, %v783_v58  ;;  %v788_v13 = vmax.f32 %v716_v53, 0.0  ;;  %1457 = vmatmul.mubr.bf16.gmra.mxu1 %v960_v14  ;;  %v626_v35 = vmul.f32 %v3000_v21, %v527_v62  ;;  %v3641_v49 = vmul.f32 %v3176_v42, %v781_v45  ;;  %v4121_v62 = vld [vmem:[#allocation22_spill] sm:$0xff]  ;;  %v4122_v58 = vld [vmem:[#allocation25_spill] sm:$0xff] }
 0x129   :  { %v3644_v43 = vmul.f32 %v4118_v17, %v785_v46  ;;  %v787_v54 = vmax.f32 %v715_v1, 0.0  ;;  %v718_v36 = vadd.f32 %v3002_v22, %v624_v28  ;;  %v3648_v32 = vmul.f32 %v4119_v40, %v782_v34  ;;  %v4123_v1 = vld [vmem:[#allocation26_spill] sm:$0xff]  ;;  %v4124_v28 = vld [vmem:[#allocation28_spill] sm:$0xff]  ;;  %v4125_v40 = vld [vmem:[#allocation29_spill] sm:$0xff] }
 0x12a   :  { %v789_v41 = vmax.f32 %v717_v0, 0.0  ;;  %v625_v44 = vmul.f32 %v3006_v24, %v406_v10  ;;  %v627_v27 = vmul.f32 %v3008_v25, %v529_v18  ;;  %v3653_v16 = vmul.f32 %v4120_v47, %v784_v61  ;;  %v539_v47 = vpop.f32.mrf.mxu1 }
 0x12b   :  { %v3656_v42 = vmul.f32 %v4121_v62, %v786_v48  ;;  %v790_v45 = vmax.f32 %v718_v36, 0.0  ;;  %v720_v53 = vadd.f32 %v3004_v23, %v626_v35  ;;  %v3660_v46 = vmul.f32 %v4122_v58, %v788_v13  ;;  %v4126_v62 = vld [vmem:[#allocation35_spill] sm:$0xff]  ;;  %v4127_v58 = vld [vmem:[#allocation36_spill] sm:$0xff] }
 0x12c   :  { %v719_v34 = vadd.f32 %v3012_v30, %v625_v44  ;;  %v721_v10 = vadd.f32 %v3014_v31, %v627_v27  ;;  %v963_v18 = vpack.c.bf16 %v3637_v56, %v3634_v8  ;;  %v3667_v14 = vmul.f32 %v4123_v1, %v787_v54  ;;  %v416_v27 = vpop.f32.mrf.mxu0 }
 0x12d   :  { %v628_v61 = vmul.f32 %v2998_v20, %v410_v11  ;;  %v630_v48 = vmul.f32 %v3000_v21, %v533_v12  ;;  %v965_v0 = vpack.c.bf16 %v3644_v43, %v3641_v49  ;;  %v3674_v13 = vmul.f32 %v4124_v28, %v789_v41 }
 0x12e   :  { %v791_v35 = vmax.f32 %v719_v34, 0.0  ;;  %v793_v17 = vmax.f32 %v721_v10, 0.0  ;;  %1367 = vmatprep.mubr.bf16.mxu0 %v963_v18  ;;  %v629_v36 = vmul.f32 %v3006_v24, %v412_v39  ;;  %v3678_v44 = vmul.f32 %v4125_v40, %v790_v45  ;;  %v4128_v40 = vld [vmem:[#allocation34_spill] sm:$0xff] }
 0x12f   :  { %v792_v54 = vmax.f32 %v720_v53, 0.0  ;;  %1464 = vmatprep.mubr.bf16.mxu1 %v965_v0  ;;  %v631_v11 = vmul.f32 %v3008_v25, %v535_v29  ;;  %v962_v12 = vpack.c.bf16 %v3648_v32, %v3606_v4  ;;  %v964_v45 = vpack.c.bf16 %v3653_v16, %v3612_v57 }
 0x130   :  { %v3684_v41 = vmul.f32 %v4126_v62, %v791_v35  ;;  %v3687_v34 = vmul.f32 %v4127_v58, %v793_v17  ;;  %v723_v39 = vadd.f32 %v3012_v30, %v629_v36  ;;  %v722_v53 = vadd.f32 %v3002_v22, %v628_v61  ;;  %v4131_v58 = vld [vmem:[#allocation4_spill] sm:$0xff] }
 0x131   :  { %v724_v29 = vadd.f32 %v3004_v23, %v630_v48  ;;  %v725_v10 = vadd.f32 %v3014_v31, %v631_v11  ;;  %1368 = vmatmul.mubr.bf16.gmra.mxu0 %v962_v12  ;;  %v632_v18 = vmul.f32 %v2998_v20, %v414_v15  ;;  %1465 = vmatmul.mubr.bf16.gmra.mxu1 %v964_v45  ;;  %v4134_v45 = vld [vmem:[#allocation13_spill] sm:$0xff] }
 0x132   :  { %v795_v1 = vmax.f32 %v723_v39, 0.0  ;;  %v634_v0 = vmul.f32 %v3000_v21, %v537_v7  ;;  %v633_v28 = vmul.f32 %v3006_v24, %v416_v27  ;;  %v635_v35 = vmul.f32 %v3008_v25, %v539_v47  ;;  %v4129_v7 = vld [vmem:[#allocation39_spill] sm:$0xff]  ;;  %v4132_v39 = vld [vmem:[#allocation8_spill] sm:$0xff] }
 0x133   :  { %v797_v17 = vmax.f32 %v725_v10, 0.0  ;;  %v726_v36 = vadd.f32 %v3002_v22, %v632_v18  ;;  %v967_v61 = vpack.c.bf16 %v3684_v41, %v3667_v14  ;;  %v969_v48 = vpack.c.bf16 %v3687_v34, %v3674_v13  ;;  %v4130_v22 = vld [vmem:[#allocation41_spill] sm:$0xff] }
 0x134   :  { %v3705_v11 = vmul.f32 %v4128_v40, %v792_v54  ;;  %v728_v20 = vadd.f32 %v3004_v23, %v634_v0  ;;  %v727_v21 = vadd.f32 %v3012_v30, %v633_v28  ;;  %v729_v24 = vadd.f32 %v3014_v31, %v635_v35  ;;  %v4133_v31 = vld [vmem:[#allocation5_spill] sm:$0xff]  ;;  %v4138_v0 = vld [vmem:[#allocation18_spill] sm:$0xff]  ;;  %v4139_v40 = vld [vmem:[#allocation24_spill] sm:$0xff] }
 0x135   :  { %v794_v15 = vmax.f32 %v722_v53, 0.0  ;;  %v796_v25 = vmax.f32 %v724_v29, 0.0  ;;  %v3711_v12 = vmul.f32 %v4129_v7, %v795_v1  ;;  %v3714_v27 = vmul.f32 %v4130_v22, %v797_v17  ;;  %1375 = vmatprep.mubr.bf16.mxu0 %v967_v61  ;;  %1472 = vmatprep.mubr.bf16.mxu1 %v969_v48  ;;  %v4135_v29 = vld [vmem:[#allocation11_spill] sm:$0xff]  ;;  %v4136_v10 = vld [vmem:[#allocation17_spill] sm:$0xff]  ;;  %v4137_v1 = vld [vmem:[#allocation12_spill] sm:$0xff] }
 0x136   :  { %v798_v47 = vmax.f32 %v726_v36, 0.0  ;;  %v799_v62 = vmax.f32 %v727_v21, 0.0  ;;  %v801_v54 = vmax.f32 %v729_v24, 0.0  ;;  %v911_v23 = vpack.c.bf16 %v4132_v39, %v4131_v58  ;;  %v4140_v21 = vld [vmem:[#allocation32_spill] sm:$0xff]  ;;  %v4141_v7 = vld [vmem:[#allocation27_spill] sm:$0xff] }
 0x137   :  { %v966_v30 = vpack.c.bf16 %v3678_v44, %v3656_v42  ;;  %v913_v53 = vpack.c.bf16 %v4134_v45, %v4133_v31  ;;  %v915_v18 = vpack.c.bf16 %v4136_v10, %v4135_v29  ;;  %v917_v28 = vpack.c.bf16 %v4138_v0, %v4137_v1  ;;  %v4144_v39 = vld [vmem:[#allocation23_spill] sm:$0xff]  ;;  %v4147_v45 = vld [vmem:[#allocation40_spill] sm:$0xff]  ;;  %v4150_v0 = vld [vmem:[#allocation37_spill] sm:$0xff] }
 0x138   :  { %v800_v35 = vmax.f32 %v728_v20, 0.0  ;;  %v907_v17 = vmul.f32 %v3414_v63, %v799_v62  ;;  %v909_v36 = vmul.f32 %v3429_v51, %v801_v54  ;;  %v968_v61 = vpack.c.bf16 %v3705_v11, %v3660_v46  ;;  %v4142_v20 = vld [vmem:[#allocation19_spill] sm:$0xff]  ;;  %v4143_v62 = vld [vmem:[#allocation30_spill] sm:$0xff]  ;;  %v4149_v10 = vld [vmem:[#allocation44_spill] sm:$0xff] }
 0x139   :  { %v3731_v48 = vmul.f32 %v3482_v60, %v794_v15  ;;  %1376 = vmatmul.mubr.bf16.gmra.mxu0 %v966_v30  ;;  %v919_v24 = vpack.c.bf16 %v4140_v21, %v4139_v40  ;;  %v921_v22 = vpack.c.bf16 %v3312_v59, %v4141_v7  ;;  %v906_v58 = vmul.f32 %v3466_v5, %v798_v47  ;;  %v4145_v60 = vld [vmem:[#allocation31_spill] sm:$0xff]  ;;  %v4146_v30 = vld [vmem:[#allocation38_spill] sm:$0xff]  ;;  %v4148_v59 = vld [vmem:[#allocation33_spill] sm:$0xff] }
 0x13a   :  { %1473 = vmatmul.mubr.bf16.gmra.mxu1 %v968_v61  ;;  %v971_v63 = vpack.c.bf16 %v907_v17, %v3711_v12  ;;  %v973_v51 = vpack.c.bf16 %v909_v36, %v3714_v27  ;;  %v918_v54 = vpack.c.bf16 %v4143_v62, %v4142_v20  ;;  %v920_v15 = vpack.c.bf16 %v4145_v60, %v4144_v39  ;;  %v4151_v17 = vld [vmem:[#allocation47_spill] sm:$0xff]  ;;  %v4152_v61 = vld [vmem:[#allocation42_spill] sm:$0xff] }
 0x13b   :  { %v923_v31 = vpack.c.bf16 %v3406_v6, %v4146_v30  ;;  %v925_v29 = vpack.c.bf16 %v3423_v55, %v4147_v45  ;;  %v922_v5 = vpack.c.bf16 %v3526_v26, %v4148_v59  ;;  %v904_v47 = vmul.f32 %v3499_v52, %v796_v25  ;;  %v4153_v21 = vld [vmem:[#allocation43_spill] sm:$0xff] }
 0x13c   :  { %v908_v1 = vmul.f32 %v4149_v10, %v800_v35  ;;  %1383 = vmatprep.mubr.bf16.mxu0 %v971_v63  ;;  %1480 = vmatprep.mubr.bf16.mxu1 %v973_v51  ;;  %v924_v36 = vpack.c.bf16 %v4151_v17, %v4150_v0  ;;  %v926_v40 = vpack.c.bf16 %v3543_v3, %v4152_v61 }
 0x13d   :  { %v928_v6 = vpack.c.bf16 %v3584_v9, %v4153_v21  ;;  %v930_v55 = vpack.c.bf16 %v3606_v4, %v3593_v37  ;;  %v932_v26 = vpack.c.bf16 %v3612_v57, %v3602_v33  ;;  %v970_v52 = vpack.c.bf16 %v906_v58, %v3731_v48  ;;  %v4154_v33 = vld [vmem:[#allocation6_spill] sm:$0xff] }
 0x13e   :  { %v934_v25 = vpack.c.bf16 %v3656_v42, %v3648_v32  ;;  %v936_v35 = vpack.c.bf16 %v3660_v46, %v3653_v16  ;;  %v941_v3 = vpack.c.bf16 %v3714_v27, %v3687_v34  ;;  %v972_v7 = vpack.c.bf16 %v908_v1, %v904_v47  ;;  %v4155_v4 = vld [vmem:[#allocation2_spill] sm:$0xff]  ;;  %v4157_v32 = vld [vmem:[#allocation7_spill] sm:$0xff]  ;;  %v4160_v46 = vld [vmem:[#allocation9_spill] sm:$0xff] }
 0x13f   :  { %v938_v9 = vpack.c.bf16 %v3731_v48, %v3678_v44  ;;  %v940_v37 = vpack.c.bf16 %v904_v47, %v3705_v11  ;;  %v4156_v57 = vpack.c.bf16 %v4154_v33, %v4155_v4  ;;  %v4158_v42 = vld [vmem:[#allocation3_spill] sm:$0xff]  ;;  %v4162_v44 = vld [vmem:[#allocation10_spill] sm:$0xff]  ;;  %v4163_v48 = vld [vmem:[#allocation16_spill] sm:$0xff]  ;;  %v931_v58 = vpack.c.bf16 %v3634_v8, %v3596_v38 }
 0x140   :  { %v4159_v16 = vpack.c.bf16 %v4157_v32, %v4158_v42  ;;  %v4161_v34 = vld [vmem:[#allocation15_spill] sm:$0xff]  ;;  %v916_v11 = vpack.c.bf16 %v4163_v48, %v4162_v44  ;;  %v939_v38 = vpack.c.bf16 %v3711_v12, %v3684_v41 }
 0x141   :  { %1384 = vmatmul.mubr.bf16.gmra.mxu0 %v970_v52  ;;  %v914_v27 = vpack.c.bf16 %v4161_v34, %v4160_v46 }
 0x142   :  { %1481 = vmatmul.mubr.bf16.gmra.mxu1 %v972_v7  ;;  %1713 = vmatprep.mubr.bf16.mxu0 %v911_v23  ;;  %v4164_v23 = vld [vmem:[#allocation45_spill] sm:$0xff] }
 0x143   :  { %1810 = vmatprep.mubr.bf16.mxu1 %v913_v53  ;;  %v927_v53 = vpack.c.bf16 %v3587_v50, %v4164_v23  ;;  %v935_v50 = vpack.c.bf16 %v3667_v14, %v3637_v56 }
 0x149   :  { %1714 = vmatmul.mubr.bf16.vlgmr.msra.gmra.mxu0 %v4156_v57 }
 0x14a   :  { %1811 = vmatmul.mubr.bf16.vlgmr.msra.gmra.mxu1 %v4159_v16  ;;  %1721 = vmatprep.mubr.bf16.mxu0 %v915_v18  ;;  %v4165_v18 = vld [vmem:[#allocation46_spill] sm:$0xff] }
 0x14b   :  { %1818 = vmatprep.mubr.bf16.mxu1 %v917_v28  ;;  %v929_v28 = vpack.c.bf16 %v3590_v19, %v4165_v18  ;;  %v937_v19 = vpack.c.bf16 %v3674_v13, %v3644_v43 }
 0x151   :  { %1722 = vmatmul.mubr.bf16.gmra.mxu0 %v914_v27 }
 0x152   :  { %1819 = vmatmul.mubr.bf16.gmra.mxu1 %v916_v11  ;;  %1729 = vmatprep.mubr.bf16.mxu0 %v919_v24  ;;  %v933_v24 = vpack.c.bf16 %v3641_v49, %v3599_v2 }
 0x153   :  { %1826 = vmatprep.mubr.bf16.mxu1 %v921_v22 }
 0x159   :  { %1730 = vmatmul.mubr.bf16.gmra.mxu0 %v918_v54 }
 0x15a   :  { %1827 = vmatmul.mubr.bf16.gmra.mxu1 %v920_v15  ;;  %1737 = vmatprep.mubr.bf16.mxu0 %v923_v31 }
 0x15b   :  { %1834 = vmatprep.mubr.bf16.mxu1 %v925_v29 }
 0x161   :  { %1738 = vmatmul.mubr.bf16.gmra.mxu0 %v922_v5 }
 0x162   :  { %1835 = vmatmul.mubr.bf16.gmra.mxu1 %v924_v36  ;;  %1745 = vmatprep.mubr.bf16.mxu0 %v927_v53 }
 0x163   :  { %1842 = vmatprep.mubr.bf16.mxu1 %v929_v28 }
 0x169   :  { %1746 = vmatmul.mubr.bf16.gmra.mxu0 %v926_v40 }
 0x16a   :  { %1843 = vmatmul.mubr.bf16.gmra.mxu1 %v928_v6  ;;  %1753 = vmatprep.mubr.bf16.mxu0 %v931_v58 }
 0x16b   :  { %1850 = vmatprep.mubr.bf16.mxu1 %v933_v24 }
 0x171   :  { %1754 = vmatmul.mubr.bf16.gmra.mxu0 %v930_v55 }
 0x172   :  { %1851 = vmatmul.mubr.bf16.gmra.mxu1 %v932_v26  ;;  %1761 = vmatprep.mubr.bf16.mxu0 %v935_v50 }
 0x173   :  { %1858 = vmatprep.mubr.bf16.mxu1 %v937_v19 }
 0x179   :  { %1762 = vmatmul.mubr.bf16.gmra.mxu0 %v934_v25 }
 0x17a   :  { %1859 = vmatmul.mubr.bf16.gmra.mxu1 %v936_v35  ;;  %1769 = vmatprep.mubr.bf16.mxu0 %v939_v38 }
 0x17b   :  { %1866 = vmatprep.mubr.bf16.mxu1 %v941_v3 }
 0x181   :  { %1770 = vmatmul.mubr.bf16.gmra.mxu0 %v938_v9 }
 0x182   :  { %1867 = vmatmul.mubr.bf16.gmra.mxu1 %v940_v37 }
 0x1bc   :  { %v2336_v2 = vpop.f32.mrf.mxu0  ;;  %v2400_v8 = vpop.f32.mrf.mxu1 }
 0x1be   :  { %v2337_v49 = vpop.f32.mrf.mxu0  ;;  %v2401_v56 = vpop.f32.mrf.mxu1 }
 0x1bf   :  { %v2338_v14 = vadd.f32 %v2337_v49, %v2336_v2  ;;  %v2402_v22 = vadd.f32 %v2401_v56, %v2400_v8 }
 0x1c0   :  { %v3796_v63 = vpop.f32.mrf.mxu0  ;;  %v3798_v43 = vpop.f32.mrf.mxu1 }
 0x1c1   :  { %v3800_v13 = vadd.f32 %v2402_v22, %v2338_v14 }
 0x1c2   :  { %v3802_v51 = vpop.f32.mrf.mxu0  ;;  %v3804_v41 = vpop.f32.mrf.mxu1 }
 0x1c8   :  { %v2342_v12 = vpop.f32.mrf.mxu0  ;;  %v2406_v20 = vpop.f32.mrf.mxu1 }
 0x1ca   :  { %v2343_v62 = vpop.f32.mrf.mxu0  ;;  %v2407_v54 = vpop.f32.mrf.mxu1 }
 0x1cb   :  { %v2344_v39 = vadd.f32 %v2343_v62, %v2342_v12  ;;  %v2408_v60 = vadd.f32 %v2407_v54, %v2406_v20 }
 0x1cc   :  { %v3806_v15 = vpop.f32.mrf.mxu0  ;;  %v3808_v30 = vpop.f32.mrf.mxu1 }
 0x1cd   :  { %v3810_v31 = vadd.f32 %v2408_v60, %v2344_v39 }
 0x1ce   :  { %v3812_v45 = vpop.f32.mrf.mxu0  ;;  %v3814_v29 = vpop.f32.mrf.mxu1 }
 0x1d2   :  { %v2348_v59 = vpop.f32.mrf.mxu0  ;;  %v2412_v5 = vpop.f32.mrf.mxu1 }
 0x1d4   :  { %v2349_v47 = vpop.f32.mrf.mxu0  ;;  %v2413_v1 = vpop.f32.mrf.mxu1 }
 0x1d5   :  { %v2350_v10 = vadd.f32 %v2349_v47, %v2348_v59  ;;  %v2414_v0 = vadd.f32 %v2413_v1, %v2412_v5 }
 0x1d6   :  { %v3816_v17 = vpop.f32.mrf.mxu0  ;;  %v3818_v36 = vpop.f32.mrf.mxu1 }
 0x1d7   :  { %v3820_v61 = vadd.f32 %v2414_v0, %v2350_v10 }
 0x1d8   :  { %v3822_v40 = vpop.f32.mrf.mxu0  ;;  %v3824_v21 = vpop.f32.mrf.mxu1 }
 0x1dc   :  { %v2354_v6 = vpop.f32.mrf.mxu0 }
 0x1dd   :  { %v2418_v55 = vpop.f32.mrf.mxu1 }
 0x1de   :  { %v2355_v26 = vpop.f32.mrf.mxu0 }
 0x1df   :  { %v2356_v52 = vadd.f32 %v2355_v26, %v2354_v6  ;;  %v2419_v25 = vpop.f32.mrf.mxu1 }
 0x1e0   :  { %v2420_v35 = vadd.f32 %v2419_v25, %v2418_v55  ;;  %v3826_v3 = vpop.f32.mrf.mxu0 }
 0x1e1   :  { %v3830_v9 = vpop.f32.mrf.mxu1 }
 0x1e2   :  { %v3828_v7 = vadd.f32 %v2420_v35, %v2356_v52  ;;  %v3832_v37 = vpop.f32.mrf.mxu0 }
 0x1e3   :  { %v3834_v33 = vpop.f32.mrf.mxu1 }
 0x1e7   :  { %v2360_v4 = vpop.f32.mrf.mxu0 }
 0x1e8   :  { %v2424_v57 = vpop.f32.mrf.mxu1 }
 0x1e9   :  { %v2361_v32 = vpop.f32.mrf.mxu0 }
 0x1ea   :  { %v2362_v42 = vadd.f32 %v2361_v32, %v2360_v4  ;;  %v2425_v16 = vpop.f32.mrf.mxu1 }
 0x1eb   :  { %v2426_v46 = vadd.f32 %v2425_v16, %v2424_v57  ;;  %v3836_v34 = vpop.f32.mrf.mxu0  ;;  %v2405_v16 = vadd.f32 %v3804_v41, %v3798_v43  ;;  %v3890_v41 = vld [vmem:[%s4027_s7] sm:$0xff] }
 0x1ec   :  { %v3838_v27 = vpop.f32.mrf.mxu1 }
 0x1ed   :  { %v3840_v44 = vadd.f32 %v2426_v46, %v2362_v42  ;;  %v3842_v48 = vpop.f32.mrf.mxu0  ;;  %v2341_v42 = vadd.f32 %v3802_v51, %v3796_v63 }
 0x1ee   :  { %v3844_v11 = vpop.f32.mrf.mxu1 }
 0x1f1   :  { %v2366_v23 = vpop.f32.mrf.mxu0  ;;  %v2430_v53 = vpop.f32.mrf.mxu1 }
 0x1f3   :  { %v2367_v18 = vpop.f32.mrf.mxu0  ;;  %v2431_v58 = vpop.f32.mrf.mxu1 }
 0x1f4   :  { %v2368_v28 = vadd.f32 %v2367_v18, %v2366_v23  ;;  %v2432_v24 = vadd.f32 %v2431_v58, %v2430_v53 }
 0x1f5   :  { %v3846_v50 = vpop.f32.mrf.mxu0  ;;  %v3848_v19 = vpop.f32.mrf.mxu1 }
 0x1f6   :  { %v3850_v38 = vadd.f32 %v2432_v24, %v2368_v28  ;;  %v3884_v24 = vld [vmem:[%s4026_s6] ss:$0 sm:$0xff] }
 0x1f7   :  { %v3852_v2 = vpop.f32.mrf.mxu0  ;;  %v3854_v8 = vpop.f32.mrf.mxu1 }
 0x1f9   :  { %v2372_v49 = vpop.f32.mrf.mxu0 }
 0x1fa   :  { %v2436_v56 = vpop.f32.mrf.mxu1 }
 0x1fb   :  { %v2373_v14 = vpop.f32.mrf.mxu0 }
 0x1fc   :  { %v2374_v22 = vadd.f32 %v2373_v14, %v2372_v49  ;;  %v2437_v12 = vpop.f32.mrf.mxu1 }
 0x1fd   :  { %v2438_v20 = vadd.f32 %v2437_v12, %v2436_v56  ;;  %v3856_v62 = vpop.f32.mrf.mxu0  ;;  %v1430_v56 = vadd.f32 %v2405_v16, %v2341_v42 }
 0x1fe   :  { %v3858_v54 = vpop.f32.mrf.mxu1 }
 0x1ff   :  { %v3860_v39 = vadd.f32 %v2438_v20, %v2374_v22  ;;  %v3862_v60 = vpop.f32.mrf.mxu0 }
 0x200   :  { %v3864_v59 = vpop.f32.mrf.mxu1 }
 0x201   :  { %v2378_v5 = vpop.f32.mrf.mxu0 }
 0x202   :  { %v2442_v47 = vpop.f32.mrf.mxu1 }
 0x203   :  { %v2379_v10 = vpop.f32.mrf.mxu0 }
 0x204   :  { %v2380_v1 = vadd.f32 %v2379_v10, %v2378_v5  ;;  %v2443_v0 = vpop.f32.mrf.mxu1  ;;  %v2347_v5 = vadd.f32 %v3812_v45, %v3806_v15 }
 0x205   :  { %v2444_v6 = vadd.f32 %v2443_v0, %v2442_v47  ;;  %v3866_v55 = vpop.f32.mrf.mxu0  ;;  %v2411_v47 = vadd.f32 %v3814_v29, %v3808_v30 }
 0x206   :  { %v3868_v26 = vpop.f32.mrf.mxu1 }
 0x207   :  { %v3870_v52 = vadd.f32 %v2444_v6, %v2380_v1  ;;  %v3872_v25 = vpop.f32.mrf.mxu0 }
 0x208   :  { %v3874_v35 = vpop.f32.mrf.mxu1 }
 0x209   :  { %v2464_v4 = vpop.f32.mrf.mxu0 }
 0x20a   :  { %v2528_v57 = vpop.f32.mrf.mxu1 }
 0x20b   :  { %v2465_v32 = vpop.f32.mrf.mxu0 }
 0x20c   :  { %v2466_v46 = vadd.f32 %v2465_v32, %v2464_v4  ;;  %v2529_v23 = vpop.f32.mrf.mxu1 }
 0x20d   :  { %v2467_v53 = vpop.f32.mrf.mxu0  ;;  %v2530_v28 = vadd.f32 %v2529_v23, %v2528_v57  ;;  %v3900_v57 = vld [vmem:[%s4027_s7 + $0x8] sm:$0xff] }
 0x20e   :  { %v1716_v18 = vadd.f32 %v2466_v46, %v3800_v13  ;;  %v2531_v58 = vpop.f32.mrf.mxu1  ;;  %v1438_v46 = vadd.f32 %v2411_v47, %v2347_v5 }
 0x20f   :  { %v2468_v49 = vpop.f32.mrf.mxu0 }
 0x210   :  { %v1813_v14 = vadd.f32 %v2530_v28, %v1716_v18  ;;  %v2469_v22 = vadd.f32 %v2468_v49, %v2467_v53  ;;  %v2532_v63 = vpop.f32.mrf.mxu1  ;;  %v3908_v49 = vld [vmem:[%s4027_s7 + $0x10] sm:$0xff] }
 0x211   :  { %v2470_v51 = vpop.f32.mrf.mxu0  ;;  %v2533_v12 = vadd.f32 %v2532_v63, %v2531_v58 }
 0x212   :  { %v1882_v43 = vadd.f32 %v3884_v24, %v1813_v14  ;;  %v1719_v13 = vadd.f32 %v2469_v22, %v1430_v56  ;;  %v2534_v20 = vpop.f32.mrf.mxu1 }
 0x213   :  { %v2471_v10 = vpop.f32.mrf.mxu0 }
 0x214   :  { %v1816_v1 = vadd.f32 %v2533_v12, %v1719_v13  ;;  %v2472_v0 = vadd.f32 %v2471_v10, %v2470_v51  ;;  %v2535_v6 = vpop.f32.mrf.mxu1  ;;  %v1986_v4 = vmul.f32 %v3890_v41, %v1882_v43 }
 0x215   :  { %v2473_v32 = vpop.f32.mrf.mxu0  ;;  %v2536_v15 = vadd.f32 %v2535_v6, %v2534_v20  ;;  %v3922_v6 = vld [vmem:[%s4027_s7 + $0x18] sm:$0xff] }
 0x216   :  { %v1883_v42 = vadd.f32 %v3884_v24, %v1816_v1  ;;  %v1724_v16 = vadd.f32 %v2472_v0, %v3810_v31  ;;  %v2537_v45 = vpop.f32.mrf.mxu1  ;;  %v2023_v58 = vmul.f32 %v1986_v4, %v1882_v43  ;;  %v2353_v1 = vadd.f32 %v3822_v40, %v3816_v17 }
 0x217   :  { %v2474_v30 = vpop.f32.mrf.mxu0  ;;  %v2417_v0 = vadd.f32 %v3824_v21, %v3818_v36 }
 0x218   :  { %v2276_v29 = vpack.c.bf16 %v1883_v42, %v1882_v43  ;;  %v1987_v23 = vmul.f32 %v3900_v57, %v1883_v42  ;;  %v1821_v53 = vadd.f32 %v2536_v15, %v1724_v16  ;;  %v2475_v18 = vadd.f32 %v2474_v30, %v2473_v32  ;;  %v2538_v28 = vpop.f32.mrf.mxu1 }
 0x219   :  { %v2539_v56 = vadd.f32 %v2538_v28, %v2537_v45  ;;  %v2476_v14 = vpop.f32.mrf.mxu0 }
 0x21a   :  { %2277 = vst [vmem:[%s4028_s8] sm:$0xff] %v2276_v29   ;;  %v2002_v31 = vadd.f32 %v1987_v23, %v1986_v4  ;;  %v2024_v22 = vmul.f32 %v1987_v23, %v1883_v42  ;;  %v1884_v63 = vadd.f32 %v3884_v24, %v1821_v53  ;;  %v1727_v51 = vadd.f32 %v2475_v18, %v1438_v46  ;;  %v2540_v13 = vpop.f32.mrf.mxu1  ;;  %v3930_v53 = vld [vmem:[%s4027_s7 + $0x20] sm:$0xff] }
 0x21b   :  { %v2477_v12 = vpop.f32.mrf.mxu0  ;;  %v1446_v23 = vadd.f32 %v2417_v0, %v2353_v1 }
 0x21c   :  { %v2039_v20 = vadd.f32 %v2024_v22, %v2023_v58  ;;  %v1988_v43 = vmul.f32 %v3908_v49, %v1884_v63  ;;  %v1824_v5 = vadd.f32 %v2539_v56, %v1727_v51  ;;  %v2478_v47 = vadd.f32 %v2477_v12, %v2476_v14  ;;  %v2541_v10 = vpop.f32.mrf.mxu1 }
 0x21d   :  { %v2542_v4 = vadd.f32 %v2541_v10, %v2540_v13  ;;  %v2479_v32 = vpop.f32.mrf.mxu0  ;;  %v2423_v13 = vadd.f32 %v3834_v33, %v3830_v9 }
 0x21e   :  { %v2003_v42 = vadd.f32 %v2002_v31, %v1988_v43  ;;  %v2025_v16 = vmul.f32 %v1988_v43, %v1884_v63  ;;  %v1885_v15 = vadd.f32 %v3884_v24, %v1824_v5  ;;  %v1732_v45 = vadd.f32 %v2478_v47, %v3820_v61  ;;  %v2543_v46 = vpop.f32.mrf.mxu1 }
 0x21f   :  { %v2480_v30 = vpop.f32.mrf.mxu0  ;;  %v2359_v31 = vadd.f32 %v3832_v37, %v3826_v3 }
 0x220   :  { %v2040_v29 = vadd.f32 %v2039_v20, %v2025_v16  ;;  %v2281_v17 = vpack.c.bf16 %v1885_v15, %v1884_v63  ;;  %v1989_v40 = vmul.f32 %v3922_v6, %v1885_v15  ;;  %v1829_v36 = vadd.f32 %v2542_v4, %v1732_v45  ;;  %v2544_v21 = vpop.f32.mrf.mxu1  ;;  %v3944_v4 = vld [vmem:[%s4027_s7 + $0x28] sm:$0xff] }
 0x221   :  { %v2481_v18 = vadd.f32 %v2480_v30, %v2479_v32  ;;  %v2482_v28 = vpop.f32.mrf.mxu0  ;;  %v2545_v63 = vadd.f32 %v2544_v21, %v2543_v46 }
 0x222   :  { %2313 = vst [vmem:[%s4028_s8 + $0x8] sm:$0xff] %v2281_v17   ;;  %v2004_v61 = vadd.f32 %v2003_v42, %v1989_v40  ;;  %v2026_v58 = vmul.f32 %v1989_v40, %v1885_v15  ;;  %v1886_v56 = vadd.f32 %v3884_v24, %v1829_v36  ;;  %v2546_v14 = vpop.f32.mrf.mxu1  ;;  %v1454_v42 = vadd.f32 %v2423_v13, %v2359_v31  ;;  %v3952_v17 = vld [vmem:[%s4027_s7 + $0x30] sm:$0xff]  ;;  %v3966_v13 = vld [vmem:[%s4027_s7 + $0x38] sm:$0xff] }
 0x223   :  { %v1735_v22 = vadd.f32 %v2481_v18, %v1446_v23  ;;  %v2483_v51 = vpop.f32.mrf.mxu0 }
 0x224   :  { %v2041_v12 = vadd.f32 %v2040_v29, %v2026_v58  ;;  %v1990_v20 = vmul.f32 %v3930_v53, %v1886_v56  ;;  %v2484_v43 = vadd.f32 %v2483_v51, %v2482_v28  ;;  %v2547_v5 = vpop.f32.mrf.mxu1 }
 0x225   :  { %v1832_v47 = vadd.f32 %v2545_v63, %v1735_v22  ;;  %v2485_v10 = vpop.f32.mrf.mxu0  ;;  %v2548_v37 = vadd.f32 %v2547_v5, %v2546_v14  ;;  %v2365_v22 = vadd.f32 %v3842_v48, %v3836_v34  ;;  %v2429_v63 = vadd.f32 %v3844_v11, %v3838_v27 }
 0x226   :  { %v2005_v1 = vadd.f32 %v2004_v61, %v1990_v20  ;;  %v2027_v0 = vmul.f32 %v1990_v20, %v1886_v56  ;;  %v1740_v3 = vadd.f32 %v2484_v43, %v3828_v7  ;;  %v2549_v32 = vpop.f32.mrf.mxu1 }
 0x227   :  { %v1887_v9 = vadd.f32 %v3884_v24, %v1832_v47  ;;  %v2486_v33 = vpop.f32.mrf.mxu0 }
 0x228   :  { %v2042_v16 = vadd.f32 %v2041_v12, %v2027_v0  ;;  %v1837_v15 = vadd.f32 %v2548_v37, %v1740_v3  ;;  %v2487_v45 = vadd.f32 %v2486_v33, %v2485_v10  ;;  %v2550_v46 = vpop.f32.mrf.mxu1  ;;  %v1462_v37 = vadd.f32 %v2429_v63, %v2365_v22 }
 0x229   :  { %v2286_v30 = vpack.c.bf16 %v1887_v9, %v1886_v56  ;;  %v1991_v29 = vmul.f32 %v3944_v4, %v1887_v9  ;;  %v2488_v40 = vpop.f32.mrf.mxu0  ;;  %v2551_v21 = vadd.f32 %v2550_v46, %v2549_v32 }
 0x22a   :  { %v1888_v7 = vadd.f32 %v3884_v24, %v1837_v15  ;;  %v1743_v36 = vadd.f32 %v2487_v45, %v1454_v42  ;;  %v2552_v23 = vpop.f32.mrf.mxu1  ;;  %v2371_v15 = vadd.f32 %v3852_v2, %v3846_v50 }
 0x22b   :  { %2314 = vst [vmem:[%s4028_s8 + $0x10] sm:$0xff] %v2286_v30   ;;  %v2006_v18 = vadd.f32 %v2005_v1, %v1991_v29  ;;  %v2028_v28 = vmul.f32 %v1991_v29, %v1887_v9  ;;  %v2489_v61 = vpop.f32.mrf.mxu0  ;;  %v2435_v29 = vadd.f32 %v3854_v8, %v3848_v19 }
 0x22c   :  { %v1992_v58 = vmul.f32 %v3952_v17, %v1888_v7  ;;  %v1840_v56 = vadd.f32 %v2551_v21, %v1743_v36  ;;  %v2490_v14 = vadd.f32 %v2489_v61, %v2488_v40  ;;  %v2553_v31 = vpop.f32.mrf.mxu1 }
 0x22d   :  { %v2043_v51 = vadd.f32 %v2042_v16, %v2028_v28  ;;  %v2554_v12 = vadd.f32 %v2553_v31, %v2552_v23  ;;  %v2491_v20 = vpop.f32.mrf.mxu0  ;;  %v1470_v31 = vadd.f32 %v2435_v29, %v2371_v15 }
 0x22e   :  { %v2007_v43 = vadd.f32 %v2006_v18, %v1992_v58  ;;  %v2029_v5 = vmul.f32 %v1992_v58, %v1888_v7  ;;  %v1889_v47 = vadd.f32 %v3884_v24, %v1840_v56  ;;  %v1748_v10 = vadd.f32 %v2490_v14, %v3840_v44  ;;  %v2555_v1 = vpop.f32.mrf.mxu1 }
 0x22f   :  { %v2492_v0 = vpop.f32.mrf.mxu0 }
 0x230   :  { %v2044_v34 = vadd.f32 %v2043_v51, %v2029_v5  ;;  %v2291_v48 = vpack.c.bf16 %v1889_v47, %v1888_v7  ;;  %v1993_v27 = vmul.f32 %v3966_v13, %v1889_v47  ;;  %v1845_v11 = vadd.f32 %v2554_v12, %v1748_v10  ;;  %v2556_v3 = vpop.f32.mrf.mxu1 }
 0x231   :  { %v2493_v32 = vadd.f32 %v2492_v0, %v2491_v20  ;;  %v2494_v9 = vpop.f32.mrf.mxu0  ;;  %v2557_v46 = vadd.f32 %v2556_v3, %v2555_v1 }
 0x232   :  { %2315 = vst [vmem:[%s4028_s8 + $0x18] sm:$0xff] %v2291_v48   ;;  %v2008_v33 = vadd.f32 %v2007_v43, %v1993_v27  ;;  %v2030_v42 = vmul.f32 %v1993_v27, %v1889_v47  ;;  %v1890_v16 = vadd.f32 %v3884_v24, %v1845_v11  ;;  %v2558_v44 = vpop.f32.mrf.mxu1  ;;  %v2441_v11 = vadd.f32 %v3864_v59, %v3858_v54 }
 0x233   :  { %v1751_v45 = vadd.f32 %v2493_v32, %v1462_v37  ;;  %v2495_v30 = vpop.f32.mrf.mxu0 }
 0x234   :  { %v2045_v40 = vadd.f32 %v2044_v34, %v2030_v42  ;;  %v1994_v7 = vmul.f32 %v3890_v41, %v1890_v16  ;;  %v2496_v36 = vadd.f32 %v2495_v30, %v2494_v9  ;;  %v2559_v21 = vpop.f32.mrf.mxu1 }
 0x235   :  { %v1848_v23 = vadd.f32 %v2557_v46, %v1751_v45  ;;  %v2497_v18 = vpop.f32.mrf.mxu0  ;;  %v2560_v56 = vadd.f32 %v2559_v21, %v2558_v44 }
 0x236   :  { %v2009_v28 = vadd.f32 %v2008_v33, %v1994_v7  ;;  %v2031_v61 = vmul.f32 %v1994_v7, %v1890_v16  ;;  %v1756_v58 = vadd.f32 %v2496_v36, %v3850_v38  ;;  %v2561_v14 = vpop.f32.mrf.mxu1  ;;  %v2383_v36 = vadd.f32 %v3872_v25, %v3866_v55 }
 0x237   :  { %v1891_v50 = vadd.f32 %v3884_v24, %v1848_v23  ;;  %v2498_v2 = vpop.f32.mrf.mxu0 }
 0x238   :  { %v2046_v22 = vadd.f32 %v2045_v40, %v2031_v61  ;;  %v1853_v63 = vadd.f32 %v2560_v56, %v1756_v58  ;;  %v2499_v19 = vadd.f32 %v2498_v2, %v2497_v18  ;;  %v2562_v8 = vpop.f32.mrf.mxu1  ;;  %v2447_v18 = vadd.f32 %v3874_v35, %v3868_v26 }
 0x239   :  { %v2296_v51 = vpack.c.bf16 %v1891_v50, %v1890_v16  ;;  %v1995_v41 = vmul.f32 %v3900_v57, %v1891_v50  ;;  %v2500_v12 = vpop.f32.mrf.mxu0  ;;  %v2563_v5 = vadd.f32 %v2562_v8, %v2561_v14  ;;  %v2377_v57 = vadd.f32 %v3862_v60, %v3856_v62 }
 0x23a   :  { %v1892_v20 = vadd.f32 %v3884_v24, %v1853_v63  ;;  %v1759_v43 = vadd.f32 %v2499_v19, %v1470_v31  ;;  %v2564_v47 = vpop.f32.mrf.mxu1  ;;  %v1486_v8 = vadd.f32 %v2447_v18, %v2383_v36 }
 0x23b   :  { %2316 = vst [vmem:[%s4028_s8 + $0x20] sm:$0xff] %v2296_v51   ;;  %v2010_v38 = vadd.f32 %v2009_v28, %v1995_v41  ;;  %v2032_v10 = vmul.f32 %v1995_v41, %v1891_v50  ;;  %v2501_v1 = vpop.f32.mrf.mxu0  ;;  %v1478_v60 = vadd.f32 %v2441_v11, %v2377_v57 }
 0x23c   :  { %v1996_v0 = vmul.f32 %v3908_v49, %v1892_v20  ;;  %v1856_v34 = vadd.f32 %v2563_v5, %v1759_v43  ;;  %v2502_v48 = vadd.f32 %v2501_v1, %v2500_v12  ;;  %v2565_v27 = vpop.f32.mrf.mxu1 }
 0x23d   :  { %v2047_v3 = vadd.f32 %v2046_v22, %v2032_v10  ;;  %v2566_v37 = vadd.f32 %v2565_v27, %v2564_v47  ;;  %v2503_v32 = vpop.f32.mrf.mxu0 }
 0x23e   :  { %v2011_v9 = vadd.f32 %v2010_v38, %v1996_v0  ;;  %v2033_v33 = vmul.f32 %v1996_v0, %v1892_v20  ;;  %v1893_v42 = vadd.f32 %v3884_v24, %v1856_v34  ;;  %v1764_v16 = vadd.f32 %v2502_v48, %v3860_v39  ;;  %v2567_v44 = vpop.f32.mrf.mxu1 }
 0x23f   :  { %v2504_v49 = vpop.f32.mrf.mxu0 }
 0x240   :  { %v2048_v15 = vadd.f32 %v2047_v3, %v2033_v33  ;;  %v2301_v45 = vpack.c.bf16 %v1893_v42, %v1892_v20  ;;  %v1997_v46 = vmul.f32 %v3922_v6, %v1893_v42  ;;  %v1861_v30 = vadd.f32 %v2566_v37, %v1764_v16  ;;  %v2568_v62 = vpop.f32.mrf.mxu1 }
 0x241   :  { %v2505_v29 = vadd.f32 %v2504_v49, %v2503_v32  ;;  %v2506_v54 = vpop.f32.mrf.mxu0  ;;  %v2569_v23 = vadd.f32 %v2568_v62, %v2567_v44 }
 0x242   :  { %2317 = vst [vmem:[%s4028_s8 + $0x28] sm:$0xff] %v2301_v45   ;;  %v2012_v59 = vadd.f32 %v2011_v9, %v1997_v46  ;;  %v2034_v40 = vmul.f32 %v1997_v46, %v1893_v42  ;;  %v1894_v7 = vadd.f32 %v3884_v24, %v1861_v30  ;;  %v2570_v39 = vpop.f32.mrf.mxu1 }
 0x243   :  { %v1767_v21 = vadd.f32 %v2505_v29, %v1478_v60  ;;  %v2507_v6 = vpop.f32.mrf.mxu0 }
 0x244   :  { %v2049_v28 = vadd.f32 %v2048_v15, %v2034_v40  ;;  %v1998_v61 = vmul.f32 %v3930_v53, %v1894_v7  ;;  %v2508_v58 = vadd.f32 %v2507_v6, %v2506_v54  ;;  %v2571_v56 = vpop.f32.mrf.mxu1 }
 0x245   :  { %v1864_v14 = vadd.f32 %v2569_v23, %v1767_v21  ;;  %v2509_v50 = vpop.f32.mrf.mxu0  ;;  %v2572_v63 = vadd.f32 %v2571_v56, %v2570_v39 }
 0x246   :  { %v2013_v2 = vadd.f32 %v2012_v59, %v1998_v61  ;;  %v2035_v31 = vmul.f32 %v1998_v61, %v1894_v7  ;;  %v1772_v22 = vadd.f32 %v2508_v58, %v3870_v52  ;;  %v2573_v19 = vpop.f32.mrf.mxu1 }
 0x247   :  { %v1895_v55 = vadd.f32 %v3884_v24, %v1864_v14  ;;  %v2510_v25 = vpop.f32.mrf.mxu0 }
 0x248   :  { %v2050_v51 = vadd.f32 %v2049_v28, %v2035_v31  ;;  %v1869_v41 = vadd.f32 %v2572_v63, %v1772_v22  ;;  %v2511_v26 = vadd.f32 %v2510_v25, %v2509_v50  ;;  %v2574_v35 = vpop.f32.mrf.mxu1 }
 0x249   :  { %v2306_v12 = vpack.c.bf16 %v1895_v55, %v1894_v7  ;;  %v1999_v53 = vmul.f32 %v3944_v4, %v1895_v55  ;;  %v2575_v5 = vadd.f32 %v2574_v35, %v2573_v19 }
 0x24a   :  { %v1896_v20 = vadd.f32 %v3884_v24, %v1869_v41  ;;  %v1775_v43 = vadd.f32 %v2511_v26, %v1486_v8 }
 0x24b   :  { %2318 = vst [vmem:[%s4028_s8 + $0x30] sm:$0xff] %v2306_v12   ;;  %v2014_v52 = vadd.f32 %v2013_v2, %v1999_v53  ;;  %v2036_v47 = vmul.f32 %v1999_v53, %v1895_v55 }
 0x24c   :  { %v2000_v38 = vmul.f32 %v3952_v17, %v1896_v20  ;;  %v1872_v10 = vadd.f32 %v2575_v5, %v1775_v43 }
 0x24d   :  { %v2051_v1 = vadd.f32 %v2050_v51, %v2036_v47 }
 0x24e   :  { %v2015_v0 = vadd.f32 %v2014_v52, %v2000_v38  ;;  %v2037_v34 = vmul.f32 %v2000_v38, %v1896_v20  ;;  %v1897_v48 = vadd.f32 %v3884_v24, %v1872_v10 }
 0x250   :  { %v2052_v27 = vadd.f32 %v2051_v1, %v2037_v34  ;;  %v2311_v4 = vpack.c.bf16 %v1897_v48, %v1896_v20  ;;  %v2001_v57 = vmul.f32 %v3966_v13, %v1897_v48 }
 0x252   :  { %2319 = vst [vmem:[%s4028_s8 + $0x38] sm:$0xff] %v2311_v4   ;;  %v2016_v11 = vadd.f32 %v2015_v0, %v2001_v57  ;;  %v2038_v3 = vmul.f32 %v2001_v57, %v1897_v48 }
 0x254   :  { %v2017_v37 = vrot.slane %v2016_v11, 4  ;;  %v2053_v32 = vadd.f32 %v2052_v27, %v2038_v3 }
 0x256   :  { %v2018_v9 = vadd.f32 %v2017_v37, %v2016_v11  ;;  %v2054_v17 = vrot.slane %v2053_v32, 4 }
 0x258   :  { %v2019_v33 = vrot.slane %v2018_v9, 2  ;;  %v2055_v42 = vadd.f32 %v2054_v17, %v2053_v32 }
 0x25a   :  { %v2020_v16 = vadd.f32 %v2019_v33, %v2018_v9  ;;  %v2056_v44 = vrot.slane %v2055_v42, 2 }
 0x25c   :  { %v2021_v49 = vrot.slane %v2020_v16, 1  ;;  %v2057_v24 = vadd.f32 %v2056_v44, %v2055_v42 }
 0x25e   :  { %v2058_v15 = vrot.slane %v2057_v24, 1  ;;  %v2022_v45 = vadd.f32 %v2021_v49, %v2020_v16 }
 0x260   :  { %v2059_v13 = vadd.f32 %v2058_v15, %v2057_v24 }
 0x262   :  { %v2061_v46 = vsel %vm2060_vm0, %v2022_v45, %v2059_v13 }
 0x263   :  { %2062 = vst [vmem:[%s4029_s9] sm:$0x3] %v2061_v46 }

// kernel: discriminator_forward.5
= control target key start
LH: loop header
LB: loop body
LE: loop exit
PB: predicated region body
PF: predicated region fallthrough
CT: control target
= control target key end

     0   :  { %vm199_vm0 = vcmask 130112   ;;  %vm206_vm1 = vcmask 195712   ;;  %vm213_vm2 = vcmask 261312   ;;  %vm220_vm3 = vcmask 326912   ;;  %s495_s0 = inlined_call_operand.vmem [shape: bf16[128,128], index: 0, kind: input, shape index: {}]   ;;  %s496_s1 = inlined_call_operand.vmem [shape: f32[1,128], index: 1, kind: input, shape index: {}]   ;;  %s497_s2 = inlined_call_operand.vmem [shape: f32[1,128], index: 2, kind: input, shape index: {}]   ;;  %s498_s3 = inlined_call_operand.vmem [shape: f32[64,128], index: 3, kind: input, shape index: {}]   ;;  %s499_s4 = inlined_call_operand.<no memory space> [shape: f32[1,1], index: 4, kind: input, shape index: {}]   ;;  %s500_s5 = inlined_call_operand.vmem [shape: f32[2,1], index: 5, kind: output, shape index: {}]  }
   0x1   :  { %v351_v0 = vld [vmem:[%s495_s0 + $0x20] sm:$0xff]   ;;  %v352_v8 = vld [vmem:[%s495_s0 + $0x28] sm:$0xff]   ;;  %v353_v34 = vld [vmem:[%s495_s0 + $0x30] sm:$0xff]   ;;  %vm227_vm4 = vcmask 392512   ;;  %vm234_vm5 = vcmask 458112   ;;  %vm241_vm6 = vcmask 523712  }
   0x2   :  { %v395_v1 = vld [vmem:[%s496_s1] ss:$0 sm:$0xff]  ;;  %v334_v2 = vunpack.c.l.bf16 %v351_v0  ;;  %v335_v4 = vunpack.c.h.bf16 %v351_v0  ;;  %v348_v9 = vld [vmem:[%s495_s0 + $0x8] sm:$0xff]   ;;  %v338_v12 = vunpack.c.l.bf16 %v352_v8  ;;  %v339_v16 = vunpack.c.h.bf16 %v352_v8  ;;  %v349_v35 = vld [vmem:[%s495_s0 + $0x10] sm:$0xff]  }
   0x3   :  { %v317_v3 = vld [vmem:[%s495_s0] sm:$0xff]   ;;  %v322_v13 = vunpack.c.l.bf16 %v348_v9  ;;  %v323_v17 = vunpack.c.h.bf16 %v348_v9  ;;  %v117_v31 = vld [vmem:[%s498_s3 + $0x8] sm:$0xff]  ;;  %v342_v42 = vunpack.c.l.bf16 %v353_v34  ;;  %v326_v43 = vunpack.c.l.bf16 %v349_v35  ;;  %v118_v45 = vld [vmem:[%s498_s3 + $0x10] sm:$0xff] }
   0x4   :  { %v403_v5 = vld [vmem:[%s497_s2] ss:$0 sm:$0xff]  ;;  %v318_v6 = vunpack.c.l.bf16 %v317_v3  ;;  %v319_v7 = vunpack.c.h.bf16 %v317_v3  ;;  %v69_v10 = vmul.f32 %v334_v2, %v395_v1  ;;  %v70_v11 = vmul.f32 %v335_v4, %v395_v1  ;;  %v354_v49 = vld [vmem:[%s495_s0 + $0x38] sm:$0xff]  }
   0x5   :  { %v71_v20 = vmul.f32 %v338_v12, %v395_v1  ;;  %v63_v21 = vmul.f32 %v322_v13, %v395_v1  ;;  %v116_v22 = vld [vmem:[%s498_s3] sm:$0xff]  ;;  %v72_v25 = vmul.f32 %v339_v16, %v395_v1  ;;  %v64_v26 = vmul.f32 %v323_v17, %v395_v1  ;;  %v350_v52 = vld [vmem:[%s495_s0 + $0x18] sm:$0xff]  }
   0x6   :  { %v61_v14 = vmul.f32 %v318_v6, %v395_v1  ;;  %v62_v15 = vmul.f32 %v319_v7, %v395_v1  ;;  %v92_v18 = vadd.f32 %v403_v5, %v69_v10  ;;  %v93_v19 = vadd.f32 %v403_v5, %v70_v11  ;;  %v119_v56 = vld [vmem:[%s498_s3 + $0x18] sm:$0xff]  ;;  %v120_v8 = vld [vmem:[%s498_s3 + $0x20] sm:$0xff] }
   0x7   :  { %v94_v29 = vadd.f32 %v403_v5, %v71_v20  ;;  %v86_v33 = vadd.f32 %v403_v5, %v63_v21  ;;  %v95_v38 = vadd.f32 %v403_v5, %v72_v25  ;;  %v87_v39 = vadd.f32 %v403_v5, %v64_v26  ;;  %v122_v26 = vld [vmem:[%s498_s3 + $0x30] sm:$0xff] }
   0x8   :  { %v84_v23 = vadd.f32 %v403_v5, %v61_v14  ;;  %v85_v24 = vadd.f32 %v403_v5, %v62_v15  ;;  %v108_v27 = vmax.f32 %v92_v18, 0.0  ;;  %v109_v28 = vmax.f32 %v93_v19, 0.0  ;;  %v121_v18 = vld [vmem:[%s498_s3 + $0x28] sm:$0xff] }
   0x9   :  { %v110_v41 = vmax.f32 %v94_v29, 0.0  ;;  %v102_v46 = vmax.f32 %v86_v33, 0.0  ;;  %v343_v47 = vunpack.c.h.bf16 %v353_v34  ;;  %v327_v48 = vunpack.c.h.bf16 %v349_v35 }
   0xa   :  { %v100_v30 = vmax.f32 %v84_v23, 0.0  ;;  %v101_v32 = vmax.f32 %v85_v24, 0.0  ;;  %v132_v36 = vmul.f32 %v116_v22, %v108_v27  ;;  %v133_v40 = vmul.f32 %v117_v31, %v109_v28 }
   0xb   :  { %v73_v50 = vmul.f32 %v342_v42, %v395_v1  ;;  %v65_v51 = vmul.f32 %v326_v43, %v395_v1  ;;  %v111_v53 = vmax.f32 %v95_v38, 0.0  ;;  %v103_v54 = vmax.f32 %v87_v39, 0.0 }
   0xc   :  { %v124_v37 = vmul.f32 %v116_v22, %v100_v30  ;;  %156 = vadd.xlane.f32.xlu1 %v132_v36  ;;  %v125_v44 = vmul.f32 %v117_v31, %v101_v32  ;;  %v134_v55 = vmul.f32 %v118_v45, %v110_v41  ;;  %v74_v58 = vmul.f32 %v343_v47, %v395_v1 }
   0xd   :  { %v96_v57 = vadd.f32 %v403_v5, %v73_v50  ;;  %v346_v59 = vunpack.c.l.bf16 %v354_v49  ;;  %v126_v60 = vmul.f32 %v118_v45, %v102_v46  ;;  %v88_v61 = vadd.f32 %v403_v5, %v65_v51 }
   0xe   :  { %140 = vadd.xlane.f32.xlu0 %v124_v37  ;;  %v66_v62 = vmul.f32 %v327_v48, %v395_v1  ;;  %v330_v63 = vunpack.c.l.bf16 %v350_v52  ;;  %v135_v0 = vmul.f32 %v119_v56, %v111_v53  ;;  %v127_v2 = vmul.f32 %v119_v56, %v103_v54 }
   0xf   :  { %v112_v3 = vmax.f32 %v96_v57, 0.0  ;;  %v97_v4 = vadd.f32 %v403_v5, %v74_v58  ;;  %v75_v6 = vmul.f32 %v346_v59, %v395_v1  ;;  %v347_v7 = vunpack.c.h.bf16 %v354_v49 }
  0x10   :  { %158 = vadd.xlane.f32.xlu1 %v133_v40  ;;  %v104_v9 = vmax.f32 %v88_v61, 0.0  ;;  %v89_v10 = vadd.f32 %v403_v5, %v66_v62  ;;  %v67_v11 = vmul.f32 %v330_v63, %v395_v1  ;;  %v331_v12 = vunpack.c.h.bf16 %v350_v52 }
  0x11   :  { %v136_v13 = vmul.f32 %v120_v8, %v112_v3  ;;  %v113_v14 = vmax.f32 %v97_v4, 0.0  ;;  %v98_v15 = vadd.f32 %v403_v5, %v75_v6  ;;  %v76_v16 = vmul.f32 %v347_v7, %v395_v1 }
  0x12   :  { %142 = vadd.xlane.f32.xlu0 %v125_v44  ;;  %v128_v17 = vmul.f32 %v120_v8, %v104_v9  ;;  %v105_v19 = vmax.f32 %v89_v10, 0.0  ;;  %v90_v20 = vadd.f32 %v403_v5, %v67_v11  ;;  %v68_v21 = vmul.f32 %v331_v12, %v395_v1  ;;  %v123_v1 = vld [vmem:[%s498_s3 + $0x38] sm:$0xff] }
  0x13   :  { %v137_v22 = vmul.f32 %v121_v18, %v113_v14  ;;  %v114_v23 = vmax.f32 %v98_v15, 0.0  ;;  %v99_v24 = vadd.f32 %v403_v5, %v76_v16  ;;  %v188_v39 = vlaneseq }
  0x14   :  { %160 = vadd.xlane.f32.xlu1 %v134_v55  ;;  %v129_v25 = vmul.f32 %v121_v18, %v105_v19  ;;  %v106_v27 = vmax.f32 %v90_v20, 0.0  ;;  %v91_v28 = vadd.f32 %v403_v5, %v68_v21  ;;  %v10_v5 = vstv %s499_s4 }
  0x15   :  { %v138_v29 = vmul.f32 %v122_v26, %v114_v23  ;;  %v115_v30 = vmax.f32 %v99_v24, 0.0  ;;  %11 = vst [vmem:[#allocation2] sm:$0x1] %v10_v5  ;;  %v189_v42 = vand.u32 127, %v188_v39  ;;  %v191_v47 = vshrl.u32 %v188_v39, 7 }
  0x16   :  { %144 = vadd.xlane.f32.xlu0 %v126_v60  ;;  %v130_v31 = vmul.f32 %v122_v26, %v106_v27  ;;  %v107_v32 = vmax.f32 %v91_v28, 0.0  ;;  %vm282_vm7 = vcmask 1041409   ;;  %vm285_vm8 = vcmask 517120  }
  0x17   :  { %v139_v33 = vmul.f32 %v123_v1, %v115_v30  ;;  %v194_v44 = vadd.s32 4294967288, %v189_v42  ;;  %v201_v46 = vadd.s32 4294967280, %v189_v42  ;;  %v208_v48 = vadd.s32 4294967272, %v189_v42 }
  0x18   :  { %162 = vadd.xlane.f32.xlu1 %v135_v0  ;;  %v131_v34 = vmul.f32 %v123_v1, %v107_v32  ;;  %v215_v49 = vadd.s32 4294967264, %v189_v42  ;;  %v222_v53 = vadd.s32 4294967256, %v189_v42  ;;  %v229_v55 = vadd.s32 4294967248, %v189_v42 }
  0x19   :  { %v197_v51 = vsub.s32 %v194_v44, %v191_v47  ;;  %v204_v54 = vsub.s32 %v201_v46, %v191_v47  ;;  %v192_v56 = vsub.s32 %v189_v42, %v191_v47  ;;  %v211_v57 = vsub.s32 %v208_v48, %v191_v47 }
  0x1a   :  { %146 = vadd.xlane.f32.xlu0 %v127_v2  ;;  %v218_v58 = vsub.s32 %v215_v49, %v191_v47  ;;  %v225_v61 = vsub.s32 %v222_v53, %v191_v47  ;;  %v236_v63 = vadd.s32 4294967240, %v189_v42  ;;  %v232_v3 = vsub.s32 %v229_v55, %v191_v47 }
  0x1b   :  { %vm307_vm9 = vcmask 1024  }
  0x1c   :  { %164 = vadd.xlane.f32.xlu1 %v136_v13  ;;  %v239_v16 = vsub.s32 %v236_v63, %v191_v47 }
  0x1e   :  { %148 = vadd.xlane.f32.xlu0 %v128_v17 }
  0x20   :  { %166 = vadd.xlane.f32.xlu1 %v137_v22 }
  0x22   :  { %150 = vadd.xlane.f32.xlu0 %v129_v25 }
  0x24   :  { %168 = vadd.xlane.f32.xlu1 %v138_v29 }
  0x26   :  { %152 = vadd.xlane.f32.xlu0 %v130_v31 }
  0x28   :  { %170 = vadd.xlane.f32.xlu1 %v139_v33 }
  0x2a   :  { %154 = vadd.xlane.f32.xlu0 %v131_v34 }
  0x95   :  { %v157_v35 = vpop.xlane.xlu1 %156 }
  0x96   :  { %v246_v4 = vrot.slane %v157_v35, %v192_v56 }
  0x97   :  { %v141_v36 = vpop.xlane.xlu0 %140 }
  0x98   :  { %v193_v8 = vrot.slane %v141_v36, %v192_v56 }
  0x99   :  { %v159_v37 = vpop.xlane.xlu1 %158 }
  0x9a   :  { %v250_v60 = vrot.slane %v159_v37, %v197_v51  ;;  %v315_v37 = vld [vmem:[#allocation2] ss:$0 sm:$0xff] }
  0x9b   :  { %v143_v38 = vpop.xlane.xlu0 %142 }
  0x9c   :  { %v198_v0 = vrot.slane %v143_v38, %v197_v51  ;;  %v251_v12 = vsel %vm199_vm0, %v250_v60, %v246_v4 }
  0x9d   :  { %v161_v40 = vpop.xlane.xlu1 %160 }
  0x9e   :  { %v255_v2 = vrot.slane %v161_v40, %v204_v54  ;;  %v200_v17 = vsel %vm199_vm0, %v198_v0, %v193_v8 }
  0x9f   :  { %v145_v41 = vpop.xlane.xlu0 %144 }
  0xa0   :  { %v205_v6 = vrot.slane %v145_v41, %v204_v54  ;;  %v256_v18 = vsel %vm206_vm1, %v255_v2, %v251_v12 }
  0xa1   :  { %v163_v43 = vpop.xlane.xlu1 %162 }
  0xa2   :  { %v260_v7 = vrot.slane %v163_v43, %v211_v57  ;;  %v207_v21 = vsel %vm206_vm1, %v205_v6, %v200_v17 }
  0xa3   :  { %v147_v45 = vpop.xlane.xlu0 %146 }
  0xa4   :  { %v212_v9 = vrot.slane %v147_v45, %v211_v57  ;;  %v261_v22 = vsel %vm213_vm2, %v260_v7, %v256_v18 }
  0xa5   :  { %v165_v50 = vpop.xlane.xlu1 %164 }
  0xa6   :  { %v265_v10 = vrot.slane %v165_v50, %v218_v58  ;;  %v214_v24 = vsel %vm213_vm2, %v212_v9, %v207_v21 }
  0xa7   :  { %v149_v52 = vpop.xlane.xlu0 %148 }
  0xa8   :  { %v219_v13 = vrot.slane %v149_v52, %v218_v58  ;;  %v266_v25 = vsel %vm220_vm3, %v265_v10, %v261_v22 }
  0xa9   :  { %v167_v59 = vpop.xlane.xlu1 %166 }
  0xaa   :  { %v270_v14 = vrot.slane %v167_v59, %v225_v61  ;;  %v221_v27 = vsel %vm220_vm3, %v219_v13, %v214_v24 }
  0xab   :  { %v151_v62 = vpop.xlane.xlu0 %150 }
  0xac   :  { %v226_v19 = vrot.slane %v151_v62, %v225_v61  ;;  %v271_v28 = vsel %vm227_vm4, %v270_v14, %v266_v25 }
  0xad   :  { %v169_v11 = vpop.xlane.xlu1 %168 }
  0xae   :  { %v275_v20 = vrot.slane %v169_v11, %v232_v3  ;;  %v228_v31 = vsel %vm227_vm4, %v226_v19, %v221_v27 }
  0xaf   :  { %v153_v15 = vpop.xlane.xlu0 %152 }
  0xb0   :  { %v233_v23 = vrot.slane %v153_v15, %v232_v3  ;;  %v276_v1 = vsel %vm234_vm5, %v275_v20, %v271_v28 }
  0xb1   :  { %v171_v26 = vpop.xlane.xlu1 %170 }
  0xb2   :  { %v280_v29 = vrot.slane %v171_v26, %v239_v16  ;;  %v235_v33 = vsel %vm234_vm5, %v233_v23, %v228_v31 }
  0xb3   :  { %v155_v30 = vpop.xlane.xlu0 %154 }
  0xb4   :  { %v240_v32 = vrot.slane %v155_v30, %v239_v16  ;;  %v281_v34 = vsel %vm241_vm6, %v280_v29, %v276_v1 }
  0xb6   :  { %v242_v5 = vsel %vm241_vm6, %v240_v32, %v235_v33 }
  0xb7   :  { %v283_v35 = vsel %vm282_vm7, %v281_v34, %v242_v5 }
  0xb8   :  { %v286_v36 = vsel %vm285_vm8, %v283_v35, 0.0 }
  0xb9   :  { %287 = vadd.xlane.f32.xlu0 %v286_v36 }
 0x142   :  { %v288_v38 = vpop.xlane.xlu0 %287 }
 0x143   :  { %v296_v39 = vadd.f32 %v315_v37, %v288_v38 }
 0x145   :  { %v297_v40 = vand.u32 2147483647, %v296_v39  ;;  %vm301_vm10 = vcmp.ge.f32.partialorder %v296_v39, 0.0 }
 0x147   :  { %v298_v41 = vsub.f32 0.0, %v297_v40 }
 0x149   :  { %v299_v42 = vmul.f32 1.442695, %v298_v41 }
 0x14b   :  { %355 = vpow2.f32 %v299_v42 }
 0x158   :  { %v356_v43 = vpop.eup %355 }
 0x159   :  { %v302_v44 = vadd.f32 1.0, %v356_v43 }
 0x15b   :  { %357 = vrcp.f32 %v302_v44 }
 0x168   :  { %v358_v45 = vpop.eup %357 }
 0x169   :  { %v305_v46 = vmul.f32 %v358_v45, %v356_v43 }
 0x16b   :  { %v306_v47 = vsel %vm301_vm10, %v358_v45, %v305_v46 }
 0x16c   :  { %308 = vst.msk [vmem:[%s500_s5] sm:$0x3] %vm307_vm9, %v306_v47 }

</bundles_post_ra>
